<compile_context>
chip_gen: v7x
topology: tpu7x:2x2x1
jax: 0.10.0
libtpu: 0.0.40
codegen_flags: <defaults>
</compile_context>

<pallas_src>
import functools

import jax
import jax.numpy as jnp
from jax import lax
from jax.experimental import pallas as pl
from jax.experimental.pallas import tpu as pltpu


_NEG_BIG = -1e30  # finite "-inf" sentinel (avoids inf-inf NaN corner cases)


def _supcon_v2_kernel(lhs_ref, rhs_ref, labi_ref, labj_ref, keep_ref, self_ref,
                      loss_ref,
                      m_s, num_s, den_s,
                      *, n_pad_cols):
    j = pl.program_id(1)          # column-tile index (reduction, innermost)

    @pl.when(j == 0)
    def _init():
        m_s[...] = jnp.full(m_s.shape, _NEG_BIG, jnp.float32)
        num_s[...] = jnp.zeros(num_s.shape, jnp.float32)
        den_s[...] = jnp.zeros(den_s.shape, jnp.float32)

    # (TM, TN) similarity / temperature tile on the MXU.  1/temperature is
    # already folded into the (bf16) LHS operand; f32 accumulation.
    s = lax.dot_general(lhs_ref[...], rhs_ref[...],
                        dimension_numbers=(((1,), (1,)), ((), ())),
                        preferred_element_type=jnp.float32)

    # Boolean label match (int32 compare, broadcast (TM,1)==(1,TN)).
    label_eq = labi_ref[...] == labj_ref[...]                         # (TM, TN)

    # Online (flash-style) max + rescale.  No masking: pad columns carry
    # similarity exactly 0 (zero features) and are subtracted at finalize; the
    # self term is subtracted at finalize as well.  The row max always
    # includes the diagonal (>= 0), so pad zeros never change it.
    m_prev = m_s[...]
    m_new = jnp.maximum(m_prev, jnp.max(s, axis=1, keepdims=True))    # (TM, 1)
    alpha = jnp.exp(m_prev - m_new)                                   # (TM, 1)
    p = jnp.exp(s - m_new)                                            # (TM, TN)

    den_t = jnp.sum(p, axis=1, keepdims=True)
    num_t = jnp.sum(jnp.where(label_eq, p, 0.0), axis=1, keepdims=True)

    num_s[...] = alpha * num_s[...] + num_t
    den_s[...] = alpha * den_s[...] + den_t
    m_s[...] = m_new

    @pl.when(j == pl.num_programs(1) - 1)
    def _finalize():
        m = m_s[...]
        # Remove the self term (always label-matched, so it sits in both num
        # and den) and the zero-similarity padding columns (den only).
        p_self = jnp.exp(self_ref[...] - m)
        num = num_s[...] - p_self
        den = den_s[...] - p_self
        if n_pad_cols:
            den = den - jnp.float32(n_pad_cols) * jnp.exp(-m)
        keep_f = keep_ref[...]                       # 1.0 / 0.0 per row
        good = keep_f > 0.5
        safe_num = jnp.where(good, num, 1.0)
        safe_den = jnp.where(good, den, 1.0)
        loss_ref[...] = -jnp.log(safe_num / safe_den) * keep_f


def _round_up(x, m):
    return ((x + m - 1) // m) * m


def _has_same_label_other(labels):
    """True where some OTHER element shares the label. O(N log N), no NxN mask."""
    order = jnp.argsort(labels)
    ls = labels[order]
    eq = ls[1:] == ls[:-1]
    false1 = jnp.zeros((1,), bool)
    dup_sorted = jnp.concatenate([eq, false1]) | jnp.concatenate([false1, eq])
    return jnp.zeros(labels.shape, bool).at[order].set(dup_sorted)


def _pick_block(n):
    # 256-wide tiles fill the v6e/v7x 256-wide MXU, but keep >= 2 row tiles
    # when possible so the "parallel" row axis can occupy both v7x TCs.
    if n <= 128:
        return _round_up(max(n, 1), 16)   # bf16 sublane packing: multiple of 16
    if n <= 384:
        return 128
    return 256


def supcon_loss_v2(features, labels, ious, temperature=0.2, iou_threshold=0.5,
                   block_size=None, matmul_dtype=jnp.bfloat16):
    """Forward pass of SupConLossV2 (mean of -log(num/den) over kept rows)."""
    features = jnp.asarray(features, jnp.float32)
    n, d = features.shape
    labels = jnp.asarray(labels).reshape(-1).astype(jnp.int32)
    ious = jnp.asarray(ious, jnp.float32).reshape(-1)

    inv_temp = jnp.float32(1.0 / temperature)

    dp = _round_up(d, 128)
    blk = block_size if block_size is not None else _pick_block(n)
    npad = _round_up(n, blk)
    tm = tn = blk
    n_pad = npad - n

    # Pad features; zero feature-padding keeps pad-column similarities exactly 0.
    feat_pad = jnp.zeros((npad, dp), jnp.float32).at[:n, :d].set(features)
    # Cast to the MXU dtype ONCE; fold 1/temperature into the LHS copy so the
    # kernel does no per-step scaling/conversion.
    lhs = (feat_pad * inv_temp).astype(matmul_dtype)
    rhs = feat_pad.astype(matmul_dtype)
    # Per-row self-similarity from the SAME cast operands, so the finalize-time
    # self-exclusion cancels the MXU's diagonal contribution ~exactly.
    self_sim = jnp.sum(lhs.astype(jnp.float32) * rhs.astype(jnp.float32),
                       axis=1, keepdims=True)                     # (npad, 1)

    # Labels: pad rows get a label that cannot match any real label.
    lab_flat = jnp.zeros((npad,), jnp.int32).at[:n].set(labels)
    if n_pad:
        lab_flat = lab_flat.at[n:].set(jnp.min(labels) - 1)
    lab_col = lab_flat.reshape(npad, 1)
    lab_row = lab_flat.reshape(1, npad)

    # keep = (has another sample with the same label) & (iou >= threshold);
    # computed here (O(N log N)) instead of counting positives per tile.
    keep_valid = _has_same_label_other(labels) & (ious >= iou_threshold)
    keep_col = jnp.zeros((npad, 1), jnp.float32).at[:n, 0].set(
        keep_valid.astype(jnp.float32))

    grid = (npad // tm, npad // tn)
    g_rows = grid[0]
    item = jnp.dtype(matmul_dtype).itemsize
    cost = pl.CostEstimate(
        flops=2 * npad * npad * dp,
        transcendentals=npad * npad + 4 * npad,
        bytes_accessed=int(npad * dp * item                 # LHS: one pass
                           + g_rows * npad * dp * item      # RHS: per row tile
                           + g_rows * npad * 4              # column labels
                           + npad * 4 * 4),                 # small per-row I/O
    )

    kernel = functools.partial(_supcon_v2_kernel, n_pad_cols=n_pad)

    loss_col = pl.pallas_call(
        kernel,
        grid=grid,
        in_specs=[
            pl.BlockSpec((tm, dp), lambda i, j: (i, 0)),   # LHS row tile (bf16, *1/T)
            pl.BlockSpec((tn, dp), lambda i, j: (j, 0)),   # RHS col tile (bf16)
            pl.BlockSpec((tm, 1), lambda i, j: (i, 0)),    # labels of row tile
            pl.BlockSpec((1, tn), lambda i, j: (0, j)),    # labels of col tile
            pl.BlockSpec((tm, 1), lambda i, j: (i, 0)),    # keep flag of row tile
            pl.BlockSpec((tm, 1), lambda i, j: (i, 0)),    # self-sim of row tile
        ],
        out_specs=pl.BlockSpec((tm, 1), lambda i, j: (i, 0)),
        out_shape=jax.ShapeDtypeStruct((npad, 1), jnp.float32),
        scratch_shapes=[
            pltpu.VMEM((tm, 1), jnp.float32),   # running row max
            pltpu.VMEM((tm, 1), jnp.float32),   # numerator
            pltpu.VMEM((tm, 1), jnp.float32),   # denominator
        ],
        compiler_params=pltpu.CompilerParams(
            dimension_semantics=("parallel", "arbitrary")),
        cost_estimate=cost,
    )(lhs, rhs, lab_col, lab_row, keep_col, self_sim)

    total = jnp.sum(loss_col)
    count = jnp.sum(keep_col)
    # Matches torch: mean over an empty keep-set yields NaN (0/0).
    return total / count


def _reference(features, labels, ious, temperature=0.2, iou_threshold=0.5):
    """Pure-JAX reference mirroring the PyTorch forward (for validation)."""
    labels = labels.reshape(-1, 1)
    label_mask = (labels == labels.T).astype(jnp.float32)
    sim = jnp.matmul(features, features.T,
                     precision=lax.Precision.HIGHEST) / temperature
    sim = sim - jnp.max(sim, axis=1, keepdims=True)
    n = sim.shape[0]
    logits_mask = 1.0 - jnp.eye(n, dtype=jnp.float32)
    exp_sim = jnp.exp(sim)
    mask = logits_mask * label_mask
    keep = (mask.sum(1) != 0) & (ious >= iou_threshold)
    num = (exp_sim * mask).sum(1)
    den = (exp_sim * logits_mask).sum(1)
    log_prob = jnp.log(jnp.where(keep, num, 1.0) / jnp.where(keep, den, 1.0))
    loss = -log_prob
    k = keep.astype(jnp.float32)
    return jnp.sum(loss * k) / jnp.sum(k)


if __name__ == "__main__":
    key = jax.random.PRNGKey(0)
    k_feat, k_lab, k_iou = jax.random.split(key, 3)

    # Small, realistic shapes: 250 proposals, 120-dim contrastive embeddings
    # (padded to 256 x 128 inside the wrapper -> 2x2 grid of 128-tiles).
    N, D = 250, 120
    feats = jax.random.normal(k_feat, (N, D), dtype=jnp.float32)
    # L2-normalize, as the contrastive head does before this loss; unnormalized
    # Gaussians with temperature=0.2 underflow exp() and give NaN even in torch.
    feats = feats / jnp.linalg.norm(feats, axis=1, keepdims=True)
    labels = jax.random.randint(k_lab, (N,), 0, 8, dtype=jnp.int32)
    ious = jax.random.uniform(k_iou, (N,), dtype=jnp.float32)

    loss = supcon_loss_v2(feats, labels, ious)
    loss = jax.block_until_ready(loss)
    ref = _reference(feats, labels, ious)
    # Tolerance absorbs the bf16 MXU operand rounding vs. the f32 reference
    # matmul; observed delta is ~1e-3 on unit-norm embeddings.
    assert bool(jnp.isfinite(loss)), loss
    assert jnp.allclose(loss, ref, rtol=2e-2, atol=2e-2), (loss, ref)

    # Tiny single-tile case (exercises N not multiple of 16, D padding, pad
    # columns, self/pad finalize corrections).
    N2, D2 = 6, 40
    f2 = jax.random.normal(jax.random.PRNGKey(1), (N2, D2), dtype=jnp.float32)
    f2 = f2 / jnp.linalg.norm(f2, axis=1, keepdims=True)
    l2 = jnp.array([0, 0, 1, 1, 2, 2], dtype=jnp.int32)
    i2 = jnp.full((N2,), 0.8, dtype=jnp.float32)
    out2 = jax.block_until_ready(supcon_loss_v2(f2, l2, i2))
    ref2 = _reference(f2, l2, i2)
    assert jnp.allclose(out2, ref2, rtol=2e-2, atol=2e-2), (out2, ref2)

    print("KERNEL_OK")
</pallas_src>

<mosaic_0001>
module attributes {stable_mosaic.version = 11 : i64} {
  func.func @_supcon_v2_kernel(%arg0: i32, %arg1: i32, %arg2: memref<128x128xbf16, #tpu.memory_space<vmem>>, %arg3: memref<128x128xbf16, #tpu.memory_space<vmem>>, %arg4: memref<128x1xi32, #tpu.memory_space<vmem>>, %arg5: memref<1x128xi32, #tpu.memory_space<vmem>>, %arg6: memref<128x1xf32, #tpu.memory_space<vmem>>, %arg7: memref<128x1xf32, #tpu.memory_space<vmem>>, %arg8: memref<128x1xf32, #tpu.memory_space<vmem>>, %arg9: memref<128x1xf32, #tpu.memory_space<vmem>>, %arg10: memref<128x1xf32, #tpu.memory_space<vmem>>, %arg11: memref<128x1xf32, #tpu.memory_space<vmem>>) attributes {dimension_semantics = [#tpu.dimension_semantics<parallel>, #tpu.dimension_semantics<arbitrary>], iteration_bounds = array<i64: 2, 2>, scalar_prefetch = 0 : i64, scratch_operands = 3 : i64, tpu.core_type = #tpu.core_type<tc>, window_params = [{transform_indices = @transform_0, window_bounds = array<i64: 128, 128>}, {transform_indices = @transform_1, window_bounds = array<i64: 128, 128>}, {transform_indices = @transform_2, window_bounds = array<i64: 128, 1>}, {transform_indices = @transform_3, window_bounds = array<i64: 1, 128>}, {transform_indices = @transform_4, window_bounds = array<i64: 128, 1>}, {transform_indices = @transform_5, window_bounds = array<i64: 128, 1>}, {transform_indices = @transform_6, window_bounds = array<i64: 128, 1>}]} {
    %c0_i32 = arith.constant 0 : i32
    %0 = arith.cmpi eq, %arg1, %c0_i32 : i32
    %1 = arith.extui %0 : i1 to i32
    %c0_i32_0 = arith.constant 0 : i32
    %2 = arith.cmpi ne, %1, %c0_i32_0 : i32
    scf.if %2 {
      %cst_25 = arith.constant -1.000000e+30 : f32
      %38 = vector.broadcast %cst_25 : f32 to vector<128x1xf32>
      %c0_26 = arith.constant 0 : index
      %c0_27 = arith.constant 0 : index
      %39 = vector.load %arg9[%c0_26, %c0_27] : memref<128x1xf32, #tpu.memory_space<vmem>>, vector<128x1xf32>
      tpu.vector_store %arg9[%c0_26, %c0_27], %38 {strides = array<i32>} : memref<128x1xf32, #tpu.memory_space<vmem>>, vector<128x1xf32>,
      %cst_28 = arith.constant 0.000000e+00 : f32
      %40 = vector.broadcast %cst_28 : f32 to vector<128x1xf32>
      %c0_29 = arith.constant 0 : index
      %c0_30 = arith.constant 0 : index
      %41 = vector.load %arg10[%c0_29, %c0_30] : memref<128x1xf32, #tpu.memory_space<vmem>>, vector<128x1xf32>
      tpu.vector_store %arg10[%c0_29, %c0_30], %40 {strides = array<i32>} : memref<128x1xf32, #tpu.memory_space<vmem>>, vector<128x1xf32>,
      %cst_31 = arith.constant 0.000000e+00 : f32
      %42 = vector.broadcast %cst_31 : f32 to vector<128x1xf32>
      %c0_32 = arith.constant 0 : index
      %c0_33 = arith.constant 0 : index
      %43 = vector.load %arg11[%c0_32, %c0_33] : memref<128x1xf32, #tpu.memory_space<vmem>>, vector<128x1xf32>
      tpu.vector_store %arg11[%c0_32, %c0_33], %42 {strides = array<i32>} : memref<128x1xf32, #tpu.memory_space<vmem>>, vector<128x1xf32>,
    } else {
    }
    %c0 = arith.constant 0 : index
    %c0_1 = arith.constant 0 : index
    %3 = vector.load %arg2[%c0, %c0_1] : memref<128x128xbf16, #tpu.memory_space<vmem>>, vector<128x128xbf16>
    %c0_2 = arith.constant 0 : index
    %c0_3 = arith.constant 0 : index
    %4 = vector.load %arg3[%c0_2, %c0_3] : memref<128x128xbf16, #tpu.memory_space<vmem>>, vector<128x128xbf16>
    %cst = arith.constant dense<0.000000e+00> : vector<128x128xf32>
    %5 = tpu.matmul %3, %4, %cst {dimension_numbers = #tpu.dot_dimension_numbers<[1], [1], [0], [0], [0, 0, 1, 0], [], []>} : vector<128x128xbf16>, vector<128x128xbf16>, vector<128x128xf32> -> vector<128x128xf32>
    %c0_4 = arith.constant 0 : index
    %c0_5 = arith.constant 0 : index
    %6 = vector.load %arg4[%c0_4, %c0_5] : memref<128x1xi32, #tpu.memory_space<vmem>>, vector<128x1xi32>
    %c0_6 = arith.constant 0 : index
    %c0_7 = arith.constant 0 : index
    %7 = vector.load %arg5[%c0_6, %c0_7] : memref<1x128xi32, #tpu.memory_space<vmem>>, vector<1x128xi32>
    %8 = vector.broadcast %6 : vector<128x1xi32> to vector<128x128xi32>
    %9 = vector.broadcast %7 : vector<1x128xi32> to vector<128x128xi32>
    %10 = arith.cmpi eq, %8, %9 : vector<128x128xi32>
    %c0_8 = arith.constant 0 : index
    %c0_9 = arith.constant 0 : index
    %11 = vector.load %arg9[%c0_8, %c0_9] : memref<128x1xf32, #tpu.memory_space<vmem>>, vector<128x1xf32>
    %cst_10 = arith.constant dense<0xFF800000> : vector<128xf32>
    %12 = vector.multi_reduction <maximumf>, %5, %cst_10 [1] : vector<128x128xf32> to vector<128xf32>
    %13 = vector.shape_cast %12 : vector<128xf32> to vector<128x1xf32>
    %14 = arith.maximumf %11, %13 : vector<128x1xf32>
    %15 = arith.subf %11, %14 : vector<128x1xf32>
    %16 = math.exp %15 : vector<128x1xf32>
    %17 = vector.broadcast %14 : vector<128x1xf32> to vector<128x128xf32>
    %18 = arith.subf %5, %17 : vector<128x128xf32>
    %19 = math.exp %18 : vector<128x128xf32>
    %cst_11 = arith.constant dense<0.000000e+00> : vector<128xf32>
    %20 = vector.multi_reduction <add>, %19, %cst_11 [1] : vector<128x128xf32> to vector<128xf32>
    %21 = vector.shape_cast %20 : vector<128xf32> to vector<128x1xf32>
    %cst_12 = arith.constant 0.000000e+00 : f32
    %22 = vector.broadcast %cst_12 : f32 to vector<128x128xf32>
    %23 = arith.select %10, %19, %22 : vector<128x128xi1>, vector<128x128xf32>
    %cst_13 = arith.constant dense<0.000000e+00> : vector<128xf32>
    %24 = vector.multi_reduction <add>, %23, %cst_13 [1] : vector<128x128xf32> to vector<128xf32>
    %25 = vector.shape_cast %24 : vector<128xf32> to vector<128x1xf32>
    %c0_14 = arith.constant 0 : index
    %c0_15 = arith.constant 0 : index
    %26 = vector.load %arg10[%c0_14, %c0_15] : memref<128x1xf32, #tpu.memory_space<vmem>>, vector<128x1xf32>
    %27 = arith.mulf %16, %26 : vector<128x1xf32>
    %28 = arith.addf %27, %25 : vector<128x1xf32>
    %c0_16 = arith.constant 0 : index
    %c0_17 = arith.constant 0 : index
    %29 = vector.load %arg10[%c0_16, %c0_17] : memref<128x1xf32, #tpu.memory_space<vmem>>, vector<128x1xf32>
    tpu.vector_store %arg10[%c0_16, %c0_17], %28 {strides = array<i32>} : memref<128x1xf32, #tpu.memory_space<vmem>>, vector<128x1xf32>,
    %c0_18 = arith.constant 0 : index
    %c0_19 = arith.constant 0 : index
    %30 = vector.load %arg11[%c0_18, %c0_19] : memref<128x1xf32, #tpu.memory_space<vmem>>, vector<128x1xf32>
    %31 = arith.mulf %16, %30 : vector<128x1xf32>
    %32 = arith.addf %31, %21 : vector<128x1xf32>
    %c0_20 = arith.constant 0 : index
    %c0_21 = arith.constant 0 : index
    %33 = vector.load %arg11[%c0_20, %c0_21] : memref<128x1xf32, #tpu.memory_space<vmem>>, vector<128x1xf32>
    tpu.vector_store %arg11[%c0_20, %c0_21], %32 {strides = array<i32>} : memref<128x1xf32, #tpu.memory_space<vmem>>, vector<128x1xf32>,
    %c0_22 = arith.constant 0 : index
    %c0_23 = arith.constant 0 : index
    %34 = vector.load %arg9[%c0_22, %c0_23] : memref<128x1xf32, #tpu.memory_space<vmem>>, vector<128x1xf32>
    tpu.vector_store %arg9[%c0_22, %c0_23], %14 {strides = array<i32>} : memref<128x1xf32, #tpu.memory_space<vmem>>, vector<128x1xf32>,
    %c1_i32 = arith.constant 1 : i32
    %35 = arith.cmpi eq, %arg1, %c1_i32 : i32
    %36 = arith.extui %35 : i1 to i32
    %c0_i32_24 = arith.constant 0 : i32
    %37 = arith.cmpi ne, %36, %c0_i32_24 : i32
    scf.if %37 {
      %c0_25 = arith.constant 0 : index
      %c0_26 = arith.constant 0 : index
      %38 = vector.load %arg9[%c0_25, %c0_26] : memref<128x1xf32, #tpu.memory_space<vmem>>, vector<128x1xf32>
      %c0_27 = arith.constant 0 : index
      %c0_28 = arith.constant 0 : index
      %39 = vector.load %arg7[%c0_27, %c0_28] : memref<128x1xf32, #tpu.memory_space<vmem>>, vector<128x1xf32>
      %40 = arith.subf %39, %38 : vector<128x1xf32>
      %41 = math.exp %40 : vector<128x1xf32>
      %c0_29 = arith.constant 0 : index
      %c0_30 = arith.constant 0 : index
      %42 = vector.load %arg10[%c0_29, %c0_30] : memref<128x1xf32, #tpu.memory_space<vmem>>, vector<128x1xf32>
      %43 = arith.subf %42, %41 : vector<128x1xf32>
      %c0_31 = arith.constant 0 : index
      %c0_32 = arith.constant 0 : index
      %44 = vector.load %arg11[%c0_31, %c0_32] : memref<128x1xf32, #tpu.memory_space<vmem>>, vector<128x1xf32>
      %45 = arith.subf %44, %41 : vector<128x1xf32>
      %cst_33 = arith.constant 0.000000e+00 : f32
      %46 = vector.broadcast %cst_33 : f32 to vector<128x1xf32>
      %47 = arith.subf %46, %38 : vector<128x1xf32>
      %48 = math.exp %47 : vector<128x1xf32>
      %cst_34 = arith.constant 6.000000e+00 : f32
      %49 = vector.broadcast %cst_34 : f32 to vector<128x1xf32>
      %50 = arith.mulf %49, %48 : vector<128x1xf32>
      %51 = arith.subf %45, %50 : vector<128x1xf32>
      %c0_35 = arith.constant 0 : index
      %c0_36 = arith.constant 0 : index
      %52 = vector.load %arg6[%c0_35, %c0_36] : memref<128x1xf32, #tpu.memory_space<vmem>>, vector<128x1xf32>
      %cst_37 = arith.constant 5.000000e-01 : f32
      %53 = vector.broadcast %cst_37 : f32 to vector<128x1xf32>
      %54 = arith.cmpf ogt, %52, %53 : vector<128x1xf32>
      %cst_38 = arith.constant 1.000000e+00 : f32
      %55 = vector.broadcast %cst_38 : f32 to vector<128x1xf32>
      %56 = arith.select %54, %43, %55 : vector<128x1xi1>, vector<128x1xf32>
      %cst_39 = arith.constant 1.000000e+00 : f32
      %57 = vector.broadcast %cst_39 : f32 to vector<128x1xf32>
      %58 = arith.select %54, %51, %57 : vector<128x1xi1>, vector<128x1xf32>
      %59 = arith.divf %56, %58 : vector<128x1xf32>
      %60 = math.log %59 : vector<128x1xf32>
      %cst_40 = arith.constant 0.000000e+00 : f32
      %61 = vector.broadcast %cst_40 : f32 to vector<128x1xf32>
      %62 = arith.subf %61, %60 : vector<128x1xf32>
      %63 = arith.mulf %62, %52 : vector<128x1xf32>
      %c0_41 = arith.constant 0 : index
      %c0_42 = arith.constant 0 : index
      %64 = vector.load %arg8[%c0_41, %c0_42] : memref<128x1xf32, #tpu.memory_space<vmem>>, vector<128x1xf32>
      tpu.vector_store %arg8[%c0_41, %c0_42], %63 {strides = array<i32>} : memref<128x1xf32, #tpu.memory_space<vmem>>, vector<128x1xf32>,
    } else {
    }
    return
  }
  func.func @transform_0(%arg0: i32, %arg1: i32) -> (i32, i32) {
    %c0_i32 = arith.constant 0 : i32
    %c0_i32_0 = arith.constant 0 : i32
    return %arg0, %c0_i32 : i32, i32
  }
  func.func @transform_1(%arg0: i32, %arg1: i32) -> (i32, i32) {
    %c0_i32 = arith.constant 0 : i32
    %c0_i32_0 = arith.constant 0 : i32
    return %arg1, %c0_i32 : i32, i32
  }
  func.func @transform_2(%arg0: i32, %arg1: i32) -> (i32, i32) {
    %c0_i32 = arith.constant 0 : i32
    %c0_i32_0 = arith.constant 0 : i32
    return %arg0, %c0_i32 : i32, i32
  }
  func.func @transform_3(%arg0: i32, %arg1: i32) -> (i32, i32) {
    %c0_i32 = arith.constant 0 : i32
    %c0_i32_0 = arith.constant 0 : i32
    return %c0_i32, %arg1 : i32, i32
  }
  func.func @transform_4(%arg0: i32, %arg1: i32) -> (i32, i32) {
    %c0_i32 = arith.constant 0 : i32
    %c0_i32_0 = arith.constant 0 : i32
    return %arg0, %c0_i32 : i32, i32
  }
  func.func @transform_5(%arg0: i32, %arg1: i32) -> (i32, i32) {
    %c0_i32 = arith.constant 0 : i32
    %c0_i32_0 = arith.constant 0 : i32
    return %arg0, %c0_i32 : i32, i32
  }
  func.func @transform_6(%arg0: i32, %arg1: i32) -> (i32, i32) {
    %c0_i32 = arith.constant 0 : i32
    %c0_i32_0 = arith.constant 0 : i32
    return %arg0, %c0_i32 : i32, i32
  }
}

</mosaic_0001>

<bundles_post_ra>
// kernel: tpu_custom_call.1
= control target key start
LH: loop header
LB: loop body
LE: loop exit
PB: predicated region body
PF: predicated region fallthrough
CT: control target
= control target key end

     0   :  { %s2160_s21 = smov 0   ;;  %s2162_s22 = smov 0   ;;  %s2964_s0 = inlined_call_operand.vmem [shape: bf16[256,128], index: 0, kind: input, shape index: {}]   ;;  %s2965_s1 = inlined_call_operand.vmem [shape: bf16[256,128], index: 1, kind: input, shape index: {}]   ;;  %s2966_s2 = inlined_call_operand.vmem [shape: s32[256,1], index: 2, kind: input, shape index: {}]   ;;  %s2967_s3 = inlined_call_operand.vmem [shape: s32[1,256], index: 3, kind: input, shape index: {}]   ;;  %s2968_s4 = inlined_call_operand.vmem [shape: f32[256,1], index: 4, kind: input, shape index: {}]   ;;  %s2969_s5 = inlined_call_operand.vmem [shape: f32[256,1], index: 5, kind: input, shape index: {}]   ;;  %s2970_s6 = inlined_call_operand.vmem [shape: f32[256,1], index: 6, kind: output, shape index: {}]  }
   0x1   :  { %s2164_s23 = smov 0   ;;  %s2166_s24 = smov 0  }
   0x2   :  { %s2168_s25 = smov 0  }
   0x3 LB: > { %s25_s26 = sadd.s32 1, %s2112_s23  ;;  %s28_s27 = sadd.s32 1, %s2116_s24  ;;  %s2120_s25 = sphi %s2168_s25, %s16_s25   ;;  %s2116_s24 = sphi %s2166_s24, %s3020_s24   ;;  %s2112_s23 = sphi %s2164_s23, %s3019_s23   ;;  %s2108_s22 = sphi %s2162_s22, %s3018_s22   ;;  %s2104_s21 = sphi %s2160_s21, %s3017_s21  }
   0x4   : > { %p26_p0 = scmp.ge.s32.totalorder %s25_s26, 2  ;;  %p1731_p1 = scmp.ge.s32.totalorder %s2120_s25, 1 }
   0x5   : > { %p277_p2 = scmp.lt.s32.totalorder %s2120_s25, 5 }
   0x6   : > { %s3022_s26 = smov (%p26_p0, %s25_s26), 0  ;;  %s3024_s27 = smov (!%p26_p0, %s28_s27), %s2116_s24 }
   0x7   : > { %p278_p3 = pnand %p1731_p1, %p277_p2  ;;  %p30_p4 = scmp.ge.s32.totalorder %s3024_s27, 2 }
   0x9   : > { %s3026_s27 = smov (%p30_p4, %s3024_s27), 0  ;;  %281 = sbr.rel (%p278_p3) target bundleno = 912 (0x390), region = 44 }
  0x10   : > { %s1732_s28 = sshll.u32 %s2108_s22, 4  ;;  %s1734_s29 = sshll.u32 %s2104_s21, 4 }
  0x11   : > { %p331_p5 = scmp.lt.s32.totalorder %s1732_s28, 31  ;;  %p337_p6 = scmp.lt.s32.totalorder %s1734_s29, 31 }
  0x12   : > { %p348_p7 = scmp.lt.s32.totalorder %s2104_s21, 1  ;;  %p1744_p8 = scmp.ne.s32.totalorder %s2104_s21, 0 }
  0x13   : > { %s3028_s28 = smov (!%p331_p5, %s1732_s28), 31  ;;  %s3030_s29 = smov (!%p337_p6, %s1734_s29), 31 }
  0x14   : > { %s1733_s30 = sshll.u32 %s3028_s28, 2  ;;  %s1737_s7 = sshll.u32 %s3028_s28, 3  ;;  %vm374_vm0 = vcmask (!%p1744_p8), 7168   ;;  %v2122_v0 = vmov (!%p1744_p8), -1e+30   ;;  %v2123_v1 = vmov (!%p1744_p8), 0.0  }
  0x15   : > { %s2197_s10 = scalar_lea.vmem %s2964_s0, %s1733_s30  ;;  %s1735_s11 = sshll.u32 %s3030_s29, 2  ;;  %375 = vst.msk [vmem:[#allocation2] sm:$0xff] (!%p1744_p8), %vm374_vm0, %v2122_v0  ;;  %376 = vst.msk [vmem:[#allocation2 + $0x8] sm:$0xff] (!%p1744_p8), %vm374_vm0, %v2122_v0 }
  0x16   : > { %s2202_s14 = scalar_lea.vmem %s2965_s1, %s1735_s11  ;;  %s2207_s17 = scalar_lea.vmem %s2966_s2, %s1737_s7  ;;  %377 = vst.msk [vmem:[#allocation2 + $0x10] sm:$0xff] (!%p1744_p8), %vm374_vm0, %v2122_v0  ;;  %378 = vst.msk [vmem:[#allocation2 + $0x18] sm:$0xff] (!%p1744_p8), %vm374_vm0, %v2122_v0 }
  0x17   : > { %s2210_s18 = scalar_select %p348_p7, %s2104_s21, 1 }
  0x18   : > { %s2215_s22 = scalar_lea.vmem %s2968_s4, %s1737_s7  ;;  %s2220_s30 = scalar_lea.vmem %s2969_s5, %s1737_s7  ;;  %379 = vst.msk [vmem:[#allocation2 + $0x20] sm:$0xff] (!%p1744_p8), %vm374_vm0, %v2122_v0  ;;  %380 = vst.msk [vmem:[#allocation2 + $0x28] sm:$0xff] (!%p1744_p8), %vm374_vm0, %v2122_v0 }
  0x19   : > { %s350_s11 = scalar_lea.vmem %s2967_s3, %s2210_s18  ;;  %s2229_s15 = scalar_lea.vmem %s2970_s6, %s1737_s7  ;;  %381 = vst.msk [vmem:[#allocation2 + $0x30] sm:$0xff] (!%p1744_p8), %vm374_vm0, %v2122_v0  ;;  %382 = vst.msk [vmem:[#allocation2 + $0x38] sm:$0xff] (!%p1744_p8), %vm374_vm0, %v2122_v0 }
  0x1a   : > { %373 = sbr.rel (%p1744_p8) target bundleno = 46 (0x2e), region = 48  ;;  %383 = vst.msk [vmem:[#allocation2 + $0x40] sm:$0xff] (!%p1744_p8), %vm374_vm0, %v2122_v0  ;;  %384 = vst.msk [vmem:[#allocation2 + $0x48] sm:$0xff] (!%p1744_p8), %vm374_vm0, %v2122_v0 }
  0x1b   : > { %385 = vst.msk [vmem:[#allocation2 + $0x50] sm:$0xff] (!%p1744_p8), %vm374_vm0, %v2122_v0  ;;  %386 = vst.msk [vmem:[#allocation2 + $0x58] sm:$0xff] (!%p1744_p8), %vm374_vm0, %v2122_v0 }
  0x1c   : > { %387 = vst.msk [vmem:[#allocation2 + $0x60] sm:$0xff] (!%p1744_p8), %vm374_vm0, %v2122_v0  ;;  %388 = vst.msk [vmem:[#allocation2 + $0x68] sm:$0xff] (!%p1744_p8), %vm374_vm0, %v2122_v0 }
  0x1d   : > { %389 = vst.msk [vmem:[#allocation2 + $0x70] sm:$0xff] (!%p1744_p8), %vm374_vm0, %v2122_v0  ;;  %390 = vst.msk [vmem:[#allocation2 + $0x78] sm:$0xff] (!%p1744_p8), %vm374_vm0, %v2122_v0 }
  0x1e   : > { %391 = vst.msk [vmem:[#allocation3] sm:$0xff] (!%p1744_p8), %vm374_vm0, %v2123_v1  ;;  %392 = vst.msk [vmem:[#allocation3 + $0x8] sm:$0xff] (!%p1744_p8), %vm374_vm0, %v2123_v1 }
  0x1f   : > { %393 = vst.msk [vmem:[#allocation3 + $0x10] sm:$0xff] (!%p1744_p8), %vm374_vm0, %v2123_v1  ;;  %394 = vst.msk [vmem:[#allocation3 + $0x18] sm:$0xff] (!%p1744_p8), %vm374_vm0, %v2123_v1 }
  0x20   : > { %395 = vst.msk [vmem:[#allocation3 + $0x20] sm:$0xff] (!%p1744_p8), %vm374_vm0, %v2123_v1  ;;  %396 = vst.msk [vmem:[#allocation3 + $0x28] sm:$0xff] (!%p1744_p8), %vm374_vm0, %v2123_v1 }
  0x21   : > { %397 = vst.msk [vmem:[#allocation3 + $0x30] sm:$0xff] %vm374_vm0, %v2123_v1  ;;  %398 = vst.msk [vmem:[#allocation3 + $0x38] sm:$0xff] %vm374_vm0, %v2123_v1 }
  0x22   : > { %399 = vst.msk [vmem:[#allocation3 + $0x40] sm:$0xff] %vm374_vm0, %v2123_v1  ;;  %400 = vst.msk [vmem:[#allocation3 + $0x48] sm:$0xff] %vm374_vm0, %v2123_v1 }
  0x23   : > { %401 = vst.msk [vmem:[#allocation3 + $0x50] sm:$0xff] %vm374_vm0, %v2123_v1  ;;  %402 = vst.msk [vmem:[#allocation3 + $0x58] sm:$0xff] %vm374_vm0, %v2123_v1 }
  0x24   : > { %403 = vst.msk [vmem:[#allocation3 + $0x60] sm:$0xff] %vm374_vm0, %v2123_v1  ;;  %404 = vst.msk [vmem:[#allocation3 + $0x68] sm:$0xff] %vm374_vm0, %v2123_v1 }
  0x25   : > { %405 = vst.msk [vmem:[#allocation3 + $0x70] sm:$0xff] %vm374_vm0, %v2123_v1  ;;  %406 = vst.msk [vmem:[#allocation3 + $0x78] sm:$0xff] %vm374_vm0, %v2123_v1 }
  0x26   : > { %407 = vst.msk [vmem:[#allocation4] sm:$0xff] %vm374_vm0, %v2123_v1  ;;  %408 = vst.msk [vmem:[#allocation4 + $0x8] sm:$0xff] %vm374_vm0, %v2123_v1 }
  0x27   : > { %409 = vst.msk [vmem:[#allocation4 + $0x10] sm:$0xff] %vm374_vm0, %v2123_v1  ;;  %410 = vst.msk [vmem:[#allocation4 + $0x18] sm:$0xff] %vm374_vm0, %v2123_v1 }
  0x28   : > { %411 = vst.msk [vmem:[#allocation4 + $0x20] sm:$0xff] %vm374_vm0, %v2123_v1  ;;  %412 = vst.msk [vmem:[#allocation4 + $0x28] sm:$0xff] %vm374_vm0, %v2123_v1 }
  0x29   : > { %413 = vst.msk [vmem:[#allocation4 + $0x30] sm:$0xff] %vm374_vm0, %v2123_v1  ;;  %414 = vst.msk [vmem:[#allocation4 + $0x38] sm:$0xff] %vm374_vm0, %v2123_v1 }
  0x2a   : > { %415 = vst.msk [vmem:[#allocation4 + $0x40] sm:$0xff] %vm374_vm0, %v2123_v1  ;;  %416 = vst.msk [vmem:[#allocation4 + $0x48] sm:$0xff] %vm374_vm0, %v2123_v1 }
  0x2b   : > { %417 = vst.msk [vmem:[#allocation4 + $0x50] sm:$0xff] %vm374_vm0, %v2123_v1  ;;  %418 = vst.msk [vmem:[#allocation4 + $0x58] sm:$0xff] %vm374_vm0, %v2123_v1 }
  0x2c   : > { %419 = vst.msk [vmem:[#allocation4 + $0x60] sm:$0xff] %vm374_vm0, %v2123_v1  ;;  %420 = vst.msk [vmem:[#allocation4 + $0x68] sm:$0xff] %vm374_vm0, %v2123_v1 }
  0x2d   : > { %421 = vst.msk [vmem:[#allocation4 + $0x70] sm:$0xff] %vm374_vm0, %v2123_v1  ;;  %422 = vst.msk [vmem:[#allocation4 + $0x78] sm:$0xff] %vm374_vm0, %v2123_v1 }
  0x2e PF: > { %v1874_v2 = vld [vmem:[%s2202_s14] sm:$0xff]   ;;  %v1875_v3 = vld [vmem:[%s2202_s14 + $0x8] sm:$0xff]   ;;  %v2124_v4 = vmov 0   ;;  %v1876_v5 = vld [vmem:[%s2202_s14 + $0x10] sm:$0xff]   ;;  %vm1101_vm1 = vcmask 7168   ;;  %p1762_p9 = scmp.ne.s32.totalorder %s2104_s21, 1 }
  0x2f   : > { %1872 = vset.pattern.permute.xlu0 %v2124_v4  ;;  %1873 = vset.pattern.permute.xlu1 %v2124_v4  ;;  %v1882_v6 = vld [vmem:[%s2197_s10] sm:$0xff]   ;;  %v1877_v8 = vld [vmem:[%s2202_s14 + $0x18] sm:$0xff]   ;;  %v649_v10 = vld [vmem:[%s2207_s17 + $0x8] sm:$0xff] }
  0x30   : > { %1781 = vmatprep.subr.bf16.mxu0 %v1874_v2  ;;  %1813 = vmatprep.subr.bf16.mxu1 %v1874_v2  ;;  %v1884_v7 = vld [vmem:[%s2197_s10 + $0x20] sm:$0xff]   ;;  %v650_v11 = vld [vmem:[%s2207_s17 + $0x10] sm:$0xff]  ;;  %v651_v13 = vld [vmem:[%s2207_s17 + $0x18] sm:$0xff] }
  0x31   : > { %1782 = vmatpush3.bf16.xpose.msra.mxu0 %v1874_v2  ;;  %1821 = vmatpush3.bf16.xpose.msra.mxu1 %v1874_v2  ;;  %v648_v9 = vld [vmem:[%s2207_s17] sm:$0xff]  ;;  %v654_v15 = vld [vmem:[%s2207_s17 + $0x30] sm:$0xff]  ;;  %v653_v16 = vld [vmem:[%s2207_s17 + $0x28] sm:$0xff] }
  0x32   : > { %1783 = vmatprep.subr.bf16.mxu0 %v1875_v3  ;;  %1814 = vmatprep.subr.bf16.mxu1 %v1875_v3  ;;  %v652_v12 = vld [vmem:[%s2207_s17 + $0x20] sm:$0xff]  ;;  %v1879_v18 = vld [vmem:[%s2202_s14 + $0x28] sm:$0xff]   ;;  %v658_v19 = vld [vmem:[%s2207_s17 + $0x50] sm:$0xff] }
  0x33   : > { %1797 = vmatprep.mubr.bf16.mxu0 %v1882_v6  ;;  %1805 = vmatprep.mubr.bf16.mxu1 %v1884_v7  ;;  %v1878_v14 = vld [vmem:[%s2202_s14 + $0x20] sm:$0xff]   ;;  %v1880_v20 = vld [vmem:[%s2202_s14 + $0x30] sm:$0xff]   ;;  %v1881_v21 = vld [vmem:[%s2202_s14 + $0x38] sm:$0xff]  }
  0x34   : > { %666 = vperm.xlu0 %1872, %v648_v9   ;;  %672 = vperm.xlu1 %1873, %v650_v11   ;;  %v656_v17 = vld [vmem:[%s2207_s17 + $0x40] sm:$0xff]  ;;  %v1883_v22 = vld [vmem:[%s2197_s10 + $0x8] sm:$0xff]   ;;  %v1886_v24 = vld [vmem:[%s2197_s10 + $0x10] sm:$0xff]  }
  0x35   : > { %v1885_v23 = vld [vmem:[%s2197_s10 + $0x28] sm:$0xff]   ;;  %v1888_v25 = vld [vmem:[%s2197_s10 + $0x30] sm:$0xff]   ;;  %v1887_v26 = vld [vmem:[%s2197_s10 + $0x18] sm:$0xff]  }
  0x36   : > { %v1889_v27 = vld [vmem:[%s2197_s10 + $0x38] sm:$0xff]   ;;  %v657_v46 = vld [vmem:[%s2207_s17 + $0x48] sm:$0xff]  ;;  %v660_v47 = vld [vmem:[%s2207_s17 + $0x60] sm:$0xff] }
  0x37   : > { %v655_v44 = vld [vmem:[%s2207_s17 + $0x38] sm:$0xff]  ;;  %v2375_v57 = vld [vmem:[#allocation2 + $0x10] sm:$0xff]  ;;  %v2377_v58 = vld [vmem:[#allocation2] sm:$0xff] }
  0x38   : > { %669 = vperm.xlu0 %1872, %v649_v10   ;;  %675 = vperm.xlu1 %1873, %v651_v13   ;;  %v659_v45 = vld [vmem:[%s2207_s17 + $0x58] sm:$0xff]  ;;  %v2385_v63 = vld [vmem:[#allocation2 + $0x50] sm:$0xff]  ;;  %v2404_v7 = vld [vmem:[#allocation2 + $0x40] sm:$0xff] }
  0x39   : > { %1784 = vmatpush3.bf16.xpose.msra.mxu0 %v1875_v3  ;;  %1822 = vmatpush3.bf16.xpose.msra.mxu1 %v1875_v3  ;;  %v2392_v1 = vld [vmem:[#allocation2 + $0x18] sm:$0xff] }
  0x3a   : > { %1785 = vmatprep.subr.bf16.mxu0 %v1876_v5  ;;  %1815 = vmatprep.subr.bf16.mxu1 %v1876_v5  ;;  %v2411_v9 = vld [vmem:[#allocation2 + $0x58] sm:$0xff] }
  0x3c   : > { %678 = vperm.xlu0 %1872, %v652_v12   ;;  %681 = vperm.xlu1 %1873, %v653_v16  }
  0x40   : > { %684 = vperm.xlu0 %1872, %v654_v15   ;;  %v2424_v15 = vld [vmem:[#allocation2 + $0x8] sm:$0xff] }
  0x41   : > { %1786 = vmatpush3.bf16.xpose.msra.mxu0 %v1876_v5  ;;  %1823 = vmatpush3.bf16.xpose.msra.mxu1 %v1876_v5 }
  0x42   : > { %1787 = vmatprep.subr.bf16.mxu0 %v1877_v8  ;;  %1816 = vmatprep.subr.bf16.mxu1 %v1877_v8 }
  0x44   : > { %690 = vperm.xlu0 %1872, %v656_v17   ;;  %v2431_v17 = vld [vmem:[#allocation2 + $0x48] sm:$0xff] }
  0x48   : > { %696 = vperm.xlu0 %1872, %v658_v19  }
  0x49   : > { %1788 = vmatpush3.bf16.xpose.msra.mxu0 %v1877_v8  ;;  %1824 = vmatpush3.bf16.xpose.msra.mxu1 %v1877_v8 }
  0x4a   : > { %1789 = vmatprep.subr.bf16.mxu0 %v1878_v14  ;;  %1817 = vmatprep.subr.bf16.mxu1 %v1878_v14 }
  0x51   : > { %1790 = vmatpush3.bf16.xpose.msra.mxu0 %v1878_v14  ;;  %1825 = vmatpush3.bf16.xpose.msra.mxu1 %v1878_v14 }
  0x52   : > { %1791 = vmatprep.subr.bf16.mxu0 %v1879_v18  ;;  %1818 = vmatprep.subr.bf16.mxu1 %v1879_v18 }
  0x59   : > { %1792 = vmatpush3.bf16.xpose.msra.mxu0 %v1879_v18  ;;  %1826 = vmatpush3.bf16.xpose.msra.mxu1 %v1879_v18 }
  0x5a   : > { %1793 = vmatprep.subr.bf16.mxu0 %v1880_v20  ;;  %1819 = vmatprep.subr.bf16.mxu1 %v1880_v20 }
  0x61   : > { %1794 = vmatpush3.bf16.xpose.msra.mxu0 %v1880_v20  ;;  %1827 = vmatpush3.bf16.xpose.msra.mxu1 %v1880_v20 }
  0x62   : > { %1795 = vmatprep.subr.bf16.mxu0 %v1881_v21  ;;  %1820 = vmatprep.subr.bf16.mxu1 %v1881_v21 }
  0x69   : > { %1796 = vmatpush3.bf16.xpose.msra.mxu0 %v1881_v21  ;;  %1828 = vmatpush3.bf16.xpose.msra.mxu1 %v1881_v21 }
  0x70   : > { %1798 = vmatmul.mubr.bf16.vlgmr.msra.gmra.mrb[0].mxu0 %v1883_v22  ;;  %1806 = vmatmul.mubr.bf16.vlgmr.msra.gmra.mrb[0].mxu1 %v1885_v23  ;;  %v2444_v23 = vld [vmem:[#allocation2 + $0x30] sm:$0xff] }
  0x71   : > { %1801 = vmatprep.mubr.bf16.mxu0 %v1886_v24  ;;  %1809 = vmatprep.mubr.bf16.mxu1 %v1888_v25  ;;  %v2451_v25 = vld [vmem:[#allocation2 + $0x38] sm:$0xff] }
  0x78   : > { %1802 = vmatmul.mubr.bf16.gmra.mrb[4].mxu0 %v1887_v26  ;;  %1810 = vmatmul.mubr.bf16.gmra.mrb[4].mxu1 %v1889_v27  ;;  %v2504_v26 = vld [vmem:[#allocation2 + $0x60] sm:$0xff] }
  0x79   : > { %2987 = vst [vmem:[#allocation11_spill] sm:$0xff] %v2504_v26 }
  0xb3   : > { %v2357_v48 = vpop.permute.xlu0 %666  ;;  %v2365_v52 = vpop.permute.xlu1 %672 }
  0xb7   : > { %v2359_v49 = vpop.permute.xlu0 %669  ;;  %v2369_v54 = vpop.permute.xlu1 %675 }
  0xbb   : > { %v2361_v50 = vpop.permute.xlu0 %678  ;;  %v2373_v56 = vpop.permute.xlu1 %681 }
  0xbf   : > { %v2363_v51 = vpop.permute.xlu0 %684 }
  0xc3   : > { %v2367_v53 = vpop.permute.xlu0 %690 }
  0xc7   : > { %v2371_v55 = vpop.permute.xlu0 %696 }
 0x143   : > { %v2305_v28 = vpop.f32.mrb[0].mxu0  ;;  %v2307_v29 = vpop.f32.mrb[0].mxu1 }
 0x144   : > { %753 = vmax.xlane.f32.xlu0 %v2305_v28  ;;  %v2310_v30 = vpop.f32.mrb[1].mxu0  ;;  %v2312_v31 = vpop.f32.mrb[1].mxu1 }
 0x145   : > { %749 = vmax.xlane.f32.xlu1 %v2310_v30  ;;  %v2315_v32 = vpop.f32.mrb[2].mxu0  ;;  %v2317_v33 = vpop.f32.mrb[2].mxu1 }
 0x146   : > { %v2319_v34 = vpop.f32.mrb[3].mxu0  ;;  %v2321_v35 = vpop.f32.mrb[3].mxu1 }
 0x148   : > { %769 = vmax.xlane.f32.xlu0 %v2307_v29 }
 0x149   : > { %755 = vmax.xlane.f32.xlu1 %v2315_v32 }
 0x14b   : > { %v2325_v36 = vpop.f32.mrb[4].mxu0  ;;  %v2327_v37 = vpop.f32.mrb[4].mxu1 }
 0x14c   : > { %765 = vmax.xlane.f32.xlu0 %v2312_v31  ;;  %v2330_v38 = vpop.f32.mrb[5].mxu0  ;;  %v2332_v39 = vpop.f32.mrb[5].mxu1 }
 0x14d   : > { %771 = vmax.xlane.f32.xlu1 %v2317_v33  ;;  %v2335_v40 = vpop.f32.mrb[6].mxu0  ;;  %v2337_v41 = vpop.f32.mrb[6].mxu1 }
 0x14e   : > { %v2339_v42 = vpop.f32.mrb[7].mxu0  ;;  %v2341_v43 = vpop.f32.mrb[7].mxu1 }
 0x150   : > { %751 = vmax.xlane.f32.xlu0 %v2319_v34 }
 0x151   : > { %767 = vmax.xlane.f32.xlu1 %v2321_v35 }
 0x154   : > { %761 = vmax.xlane.f32.xlu0 %v2325_v36 }
 0x155   : > { %763 = vmax.xlane.f32.xlu1 %v2335_v40 }
 0x158   : > { %777 = vmax.xlane.f32.xlu0 %v2327_v37 }
 0x159   : > { %779 = vmax.xlane.f32.xlu1 %v2337_v41 }
 0x15c   : > { %757 = vmax.xlane.f32.xlu0 %v2330_v38 }
 0x15d   : > { %759 = vmax.xlane.f32.xlu1 %v2339_v42 }
 0x160   : > { %773 = vmax.xlane.f32.xlu0 %v2332_v39 }
 0x161   : > { %775 = vmax.xlane.f32.xlu1 %v2341_v43 }
 0x172   : > { %687 = vperm.xlu1 %1873, %v655_v44  }
 0x176   : > { %699 = vperm.xlu0 %1872, %v659_v45   ;;  %693 = vperm.xlu1 %1873, %v657_v46  }
 0x17a   : > { %702 = vperm.xlu1 %1873, %v660_v47   ;;  %v2464_v47 = vld [vmem:[#allocation2 + $0x70] sm:$0xff] }
 0x1d1   : > { %v754_v59 = vpop.xlane.xlu0 %753 }
 0x1d2   : > { %v2380_v60 = vmax.f32 %v2375_v57, %v754_v59  ;;  %v750_v61 = vpop.xlane.xlu1 %749 }
 0x1d3   : > { %v2383_v62 = vmax.f32 %v2377_v58, %v750_v61  ;;  %v2471_v61 = vld [vmem:[#allocation2 + $0x78] sm:$0xff] }
 0x1d4   : > { %1184 = vst.msk [vmem:[#allocation2 + $0x10] sm:$0xff] %vm1101_vm1, %v2380_v60  ;;  %857 = vperm.xlu1 %1873, %v2380_v60   ;;  %2981 = vst [vmem:[#allocation5_spill] sm:$0xff] %v2471_v61 }
 0x1d5   : > { %1182 = vst.msk [vmem:[#allocation2] sm:$0xff] %vm1101_vm1, %v2383_v62  ;;  %v770_v3 = vpop.xlane.xlu0 %769 }
 0x1d6   : > { %v2399_v4 = vmax.f32 %v2385_v63, %v770_v3  ;;  %v756_v5 = vpop.xlane.xlu1 %755  ;;  %v2492_v3 = vld [vmem:[#allocation2 + $0x28] sm:$0xff] }
 0x1d7   : > { %v2402_v6 = vmax.f32 %v2392_v1, %v756_v5  ;;  %2984 = vst [vmem:[#allocation8_spill] sm:$0xff] %v2492_v3 }
 0x1d8   : > { %1192 = vst.msk [vmem:[#allocation2 + $0x50] sm:$0xff] %vm1101_vm1, %v2399_v4  ;;  %897 = vperm.xlu1 %1873, %v2399_v4  }
 0x1d9   : > { %1185 = vst.msk [vmem:[#allocation2 + $0x18] sm:$0xff] %vm1101_vm1, %v2402_v6  ;;  %v766_v11 = vpop.xlane.xlu0 %765  ;;  %862 = vperm.xlu0 %1872, %v2402_v6  }
 0x1da   : > { %v2419_v12 = vmax.f32 %v2404_v7, %v766_v11  ;;  %v772_v13 = vpop.xlane.xlu1 %771 }
 0x1db   : > { %v2422_v14 = vmax.f32 %v2411_v9, %v772_v13 }
 0x1dc   : > { %1190 = vst.msk [vmem:[#allocation2 + $0x40] sm:$0xff] %vm1101_vm1, %v2419_v12  ;;  %847 = vperm.xlu1 %1873, %v2383_v62  }
 0x1dd   : > { %1193 = vst.msk [vmem:[#allocation2 + $0x58] sm:$0xff] %vm1101_vm1, %v2422_v14  ;;  %v752_v19 = vpop.xlane.xlu0 %751  ;;  %902 = vperm.xlu0 %1872, %v2422_v14  }
 0x1de   : > { %v2439_v20 = vmax.f32 %v2424_v15, %v752_v19  ;;  %v768_v21 = vpop.xlane.xlu1 %767  ;;  %v662_v19 = vld [vmem:[%s2207_s17 + $0x70] sm:$0xff] }
 0x1df   : > { %v2442_v22 = vmax.f32 %v2431_v17, %v768_v21 }
 0x1e0   : > { %1183 = vst.msk [vmem:[#allocation2 + $0x8] sm:$0xff] %vm1101_vm1, %v2439_v20  ;;  %887 = vperm.xlu1 %1873, %v2419_v12  }
 0x1e1   : > { %1191 = vst.msk [vmem:[#allocation2 + $0x48] sm:$0xff] %vm1101_vm1, %v2442_v22  ;;  %v762_v27 = vpop.xlane.xlu0 %761  ;;  %852 = vperm.xlu0 %1872, %v2439_v20  }
 0x1e2   : > { %v2459_v44 = vmax.f32 %v2444_v23, %v762_v27  ;;  %v764_v45 = vpop.xlane.xlu1 %763  ;;  %v2485_v27 = vld [vmem:[#allocation2 + $0x20] sm:$0xff] }
 0x1e3   : > { %v2462_v46 = vmax.f32 %v2451_v25, %v764_v45  ;;  %2983 = vst [vmem:[#allocation7_spill] sm:$0xff] %v2485_v27 }
 0x1e4   : > { %1188 = vst.msk [vmem:[#allocation2 + $0x30] sm:$0xff] %vm1101_vm1, %v2459_v44  ;;  %877 = vperm.xlu1 %1873, %v2459_v44  }
 0x1e5   : > { %1189 = vst.msk [vmem:[#allocation2 + $0x38] sm:$0xff] %vm1101_vm1, %v2462_v46  ;;  %v778_v5 = vpop.xlane.xlu0 %777  ;;  %892 = vperm.xlu0 %1872, %v2442_v22  }
 0x1e6   : > { %v2479_v11 = vmax.f32 %v2464_v47, %v778_v5  ;;  %v780_v13 = vpop.xlane.xlu1 %779 }
 0x1e7   : > { %v2483_v21 = vmax.f32 %v2471_v61, %v780_v13 }
 0x1e8   : > { %1196 = vst.msk [vmem:[#allocation2 + $0x70] sm:$0xff] %vm1101_vm1, %v2479_v11  ;;  %917 = vperm.xlu1 %1873, %v2479_v11  }
 0x1e9   : > { %2982 = vst [vmem:[#allocation6_spill] sm:$0xff] %v2483_v21  ;;  %1197 = vst.msk [vmem:[#allocation2 + $0x78] sm:$0xff] %vm1101_vm1, %v2483_v21  ;;  %708 = vperm.xlu0 %1872, %v662_v19   ;;  %v758_v13 = vpop.xlane.xlu0 %757  ;;  %v2511_v19 = vld [vmem:[#allocation2 + $0x68] sm:$0xff] }
 0x1ea   : > { %v2499_v59 = vmax.f32 %v2485_v27, %v758_v13  ;;  %v760_v24 = vpop.xlane.xlu1 %759  ;;  %2988 = vst [vmem:[#allocation12_spill] sm:$0xff] %v2511_v19 }
 0x1eb   : > { %v2502_v45 = vmax.f32 %v2492_v3, %v760_v24 }
 0x1ec   : > { %2985 = vst [vmem:[#allocation9_spill] sm:$0xff] %v2499_v59  ;;  %1186 = vst.msk [vmem:[#allocation2 + $0x20] sm:$0xff] %vm1101_vm1, %v2499_v59  ;;  %867 = vperm.xlu1 %1873, %v2499_v59  }
 0x1ed   : > { %2986 = vst [vmem:[#allocation10_spill] sm:$0xff] %v2502_v45  ;;  %1187 = vst.msk [vmem:[#allocation2 + $0x28] sm:$0xff] %vm1101_vm1, %v2502_v45  ;;  %v774_v24 = vpop.xlane.xlu0 %773  ;;  %882 = vperm.xlu0 %1872, %v2462_v46  }
 0x1ee   : > { %v2519_v18 = vmax.f32 %v2504_v26, %v774_v24  ;;  %v776_v5 = vpop.xlane.xlu1 %775  ;;  %v661_v24 = vld [vmem:[%s2207_s17 + $0x68] sm:$0xff] }
 0x1ef   : > { %v2522_v16 = vmax.f32 %v2511_v19, %v776_v5  ;;  %v663_v5 = vld [vmem:[%s2207_s17 + $0x78] sm:$0xff] }
 0x1f0   : > { %2989 = vst [vmem:[#allocation13_spill] sm:$0xff] %v2519_v18  ;;  %1194 = vst.msk [vmem:[#allocation2 + $0x60] sm:$0xff] %vm1101_vm1, %v2519_v18  ;;  %907 = vperm.xlu1 %1873, %v2519_v18  }
 0x1f1   : > { %2990 = vst [vmem:[#allocation14_spill] sm:$0xff] %v2522_v16  ;;  %1195 = vst.msk [vmem:[#allocation2 + $0x68] sm:$0xff] %vm1101_vm1, %v2522_v16  ;;  %922 = vperm.xlu0 %1872, %v2483_v21  }
 0x1f2   : > { %v2538_v10 = vpop.permute.xlu1 %687 }
 0x1f4   : > { %705 = vperm.xlu1 %1873, %v661_v24  }
 0x1f5   : > { %872 = vperm.xlu0 %1872, %v2502_v45   ;;  %v2544_v0 = vpop.permute.xlu0 %699 }
 0x1f6   : > { %v2540_v2 = vpop.permute.xlu1 %693 }
 0x1f8   : > { %711 = vperm.xlu1 %1873, %v663_v5  }
 0x1f9   : > { %912 = vperm.xlu0 %1872, %v2522_v16  }
 0x1fa   : > { %v2542_v8 = vpop.permute.xlu1 %702 }
 0x253   : > { %v858_v13 = vpop.permute.xlu1 %857 }
 0x254   : > { %v927_v19 = vsub.f32 %v2305_v28, %v858_v13 }
 0x256   : > { %v945_v18 = vmul.f32 1.442695, %v927_v19 }
 0x257   : > { %v898_v26 = vpop.permute.xlu1 %897 }
 0x258   : > { %1890 = vpow2.f32 %v945_v18  ;;  %v935_v24 = vsub.f32 %v2307_v29, %v898_v26  ;;  %v863_v5 = vpop.permute.xlu0 %862 }
 0x259   : > { %v928_v16 = vsub.f32 %v2315_v32, %v863_v5  ;;  %v2557_v32 = vld [vmem:[%s350_s11] ss:$0 sm:$0xff] }
 0x25a   : > { %v961_v45 = vmul.f32 1.442695, %v935_v24  ;;  %vm719_vm2 = vcmp.eq.s32.totalorder %v2365_v52, %v2557_v32  ;;  %vm720_vm3 = vcmp.eq.s32.totalorder %v2369_v54, %v2557_v32  ;;  %vm717_vm4 = vcmp.eq.s32.totalorder %v2357_v48, %v2557_v32 }
 0x25b   : > { %v947_v3 = vmul.f32 1.442695, %v928_v16  ;;  %v848_v59 = vpop.permute.xlu1 %847  ;;  %vm725_vm5 = vcmp.eq.s32.totalorder %v2367_v53, %v2557_v32  ;;  %vm718_vm6 = vcmp.eq.s32.totalorder %v2359_v49, %v2557_v32  ;;  %vm723_vm7 = vcmp.eq.s32.totalorder %v2363_v51, %v2557_v32 }
 0x25c   : > { %1892 = vpow2.f32 %v961_v45  ;;  %v925_v27 = vsub.f32 %v2310_v30, %v848_v59  ;;  %v903_v21 = vpop.permute.xlu0 %902  ;;  %vm727_vm8 = vcmp.eq.s32.totalorder %v2371_v55, %v2557_v32  ;;  %vm721_vm9 = vcmp.eq.s32.totalorder %v2361_v50, %v2557_v32 }
 0x25d   : > { %1894 = vpow2.f32 %v947_v3  ;;  %v936_v28 = vsub.f32 %v2317_v33, %v903_v21  ;;  %vm724_vm10 = vcmp.eq.s32.totalorder %v2538_v10, %v2557_v32  ;;  %vm728_vm11 = vcmp.eq.s32.totalorder %v2544_v0, %v2557_v32 }
 0x25e   : > { %v941_v61 = vmul.f32 1.442695, %v925_v27  ;;  %vm726_vm12 = vcmp.eq.s32.totalorder %v2540_v2, %v2557_v32  ;;  %vm722_vm13 = vcmp.eq.s32.totalorder %v2373_v56, %v2557_v32  ;;  %vm729_vm14 = vcmp.eq.s32.totalorder %v2542_v8, %v2557_v32 }
 0x25f   : > { %v888_v19 = vpop.permute.xlu1 %887  ;;  %v963_v59 = vmul.f32 1.442695, %v936_v28  ;;  %v2991_v8 = vsub.f32 %v2375_v57, %v2380_v60 }
 0x260   : > { %1896 = vpow2.f32 %v941_v61  ;;  %v933_v18 = vsub.f32 %v2312_v31, %v888_v19  ;;  %v853_v29 = vpop.permute.xlu0 %852 }
 0x261   : > { %v926_v16 = vsub.f32 %v2319_v34, %v853_v29 }
 0x262   : > { %v1891_v26 = vpop.eup %1890  ;;  %v957_v30 = vmul.f32 1.442695, %v933_v18 }
 0x263   : > { %v943_v33 = vmul.f32 1.442695, %v926_v16  ;;  %977 = vadd.xlane.f32.xlu0 %v1891_v26  ;;  %v878_v61 = vpop.permute.xlu1 %877  ;;  %v1007_v3 = vsel %vm719_vm2, %v1891_v26, 0.0 }
 0x264   : > { %1898 = vpow2.f32 %v957_v30  ;;  %v931_v31 = vsub.f32 %v2325_v36, %v878_v61  ;;  %v893_v21 = vpop.permute.xlu0 %892 }
 0x265   : > { %1900 = vpow2.f32 %v943_v33  ;;  %v934_v27 = vsub.f32 %v2321_v35, %v893_v21 }
 0x266   : > { %v1893_v45 = vpop.eup %1892  ;;  %v953_v13 = vmul.f32 1.442695, %v931_v31  ;;  %1902 = vpow2.f32 %v963_v59 }
 0x267   : > { %v1895_v34 = vpop.eup %1894  ;;  %993 = vadd.xlane.f32.xlu1 %v1893_v45  ;;  %v918_v52 = vpop.permute.xlu1 %917  ;;  %v959_v24 = vmul.f32 1.442695, %v934_v27  ;;  %v1015_v31 = vsel %vm727_vm8, %v1893_v45, 0.0 }
 0x268   : > { %1904 = vpow2.f32 %v953_v13  ;;  %v2566_v5 = vpop.permute.xlu0 %708  ;;  %v1008_v28 = vsel %vm720_vm3, %v1895_v34, 0.0  ;;  %v939_v21 = vsub.f32 %v2327_v37, %v918_v52 }
 0x269   : > { %1906 = vpow2.f32 %v959_v24  ;;  %vm731_vm15 = vcmp.eq.s32.totalorder %v2566_v5, %v2557_v32 }
 0x26a   : > { %v1897_v19 = vpop.eup %1896  ;;  %v969_v55 = vmul.f32 1.442695, %v939_v21  ;;  %v1128_v21 = vld [vmem:[#allocation4 + $0x50] sm:$0xff] }
 0x26b   : > { %973 = vadd.xlane.f32.xlu0 %v1897_v19  ;;  %v868_v35 = vpop.permute.xlu1 %867  ;;  %v1005_v36 = vsel %vm717_vm4, %v1897_v19, 0.0 }
 0x26c   : > { %v929_v18 = vsub.f32 %v2330_v38, %v868_v35  ;;  %v883_v29 = vpop.permute.xlu0 %882 }
 0x26d   : > { %v932_v54 = vsub.f32 %v2335_v40, %v883_v29 }
 0x26e   : > { %v1899_v16 = vpop.eup %1898  ;;  %v949_v26 = vmul.f32 1.442695, %v929_v18 }
 0x26f   : > { %v1901_v30 = vpop.eup %1900  ;;  %v955_v59 = vmul.f32 1.442695, %v932_v54  ;;  %979 = vadd.xlane.f32.xlu0 %v1895_v34  ;;  %989 = vadd.xlane.f32.xlu1 %v1899_v16  ;;  %v1013_v48 = vsel %vm725_vm5, %v1899_v16, 0.0  ;;  %v908_v34 = vpop.permute.xlu1 %907 }
 0x270   : > { %1908 = vpow2.f32 %v949_v26  ;;  %v1006_v33 = vsel %vm718_vm6, %v1901_v30, 0.0  ;;  %v1903_v61 = vpop.eup %1902  ;;  %v923_v53 = vpop.permute.xlu0 %922  ;;  %v937_v52 = vsub.f32 %v2332_v39, %v908_v34 }
 0x271   : > { %1910 = vpow2.f32 %v955_v59  ;;  %v940_v45 = vsub.f32 %v2337_v41, %v923_v53  ;;  %v1016_v37 = vsel %vm728_vm11, %v1903_v61, 0.0  ;;  %v2995_v53 = vsub.f32 %v2404_v7, %v2419_v12 }
 0x272   : > { %v1905_v38 = vpop.eup %1904  ;;  %1912 = vpow2.f32 %v969_v55  ;;  %v965_v19 = vmul.f32 1.442695, %v937_v52 }
 0x273   : > { %995 = vadd.xlane.f32.xlu0 %v1903_v61  ;;  %1025 = vadd.xlane.f32.xlu1 %v1007_v3  ;;  %v1011_v40 = vsel %vm723_vm7, %v1905_v38, 0.0  ;;  %v1907_v49 = vpop.eup %1906  ;;  %v971_v50 = vmul.f32 1.442695, %v940_v45  ;;  %v706_v2 = vpop.permute.xlu1 %705  ;;  %v2993_v61 = vsub.f32 %v2377_v58, %v2383_v62  ;;  %v829_v57 = vmul.f32 1.442695, %v2995_v53  ;;  %v1121_v45 = vld [vmem:[#allocation4 + $0x18] sm:$0xff] }
 0x274   : > { %v873_v51 = vpop.permute.xlu0 %872  ;;  %v1014_v0 = vsel %vm726_vm12, %v1907_v49, 0.0  ;;  %vm730_vm0 = vcmp.eq.s32.totalorder %v706_v2, %v2557_v32  ;;  %v1127_v2 = vld [vmem:[#allocation4 + $0x48] sm:$0xff] }
 0x275   : > { %v930_v10 = vsub.f32 %v2339_v42, %v873_v51  ;;  %1914 = vpow2.f32 %v971_v50  ;;  %v1118_v51 = vld [vmem:[#allocation4] sm:$0xff] }
 0x276   : > { %1916 = vpow2.f32 %v965_v19  ;;  %v1055_v19 = vld [vmem:[#allocation3 + $0x10] sm:$0xff] }
 0x277   : > { %991 = vadd.xlane.f32.xlu0 %v1907_v49  ;;  %1041 = vadd.xlane.f32.xlu1 %v1015_v31  ;;  %v951_v35 = vmul.f32 1.442695, %v930_v10  ;;  %v712_v26 = vpop.permute.xlu1 %711  ;;  %v1120_v49 = vld [vmem:[#allocation4 + $0x10] sm:$0xff] }
 0x278   : > { %vm732_vm2 = vcmp.eq.s32.totalorder %v712_v26, %v2557_v32 }
 0x279   : > { %1918 = vpow2.f32 %v951_v35 }
 0x27a   : > { %v1909_v27 = vpop.eup %1908 }
 0x27b   : > { %v1911_v13 = vpop.eup %1910  ;;  %1027 = vadd.xlane.f32.xlu0 %v1008_v28  ;;  %1021 = vadd.xlane.f32.xlu1 %v1005_v36  ;;  %v1009_v3 = vsel %vm721_vm9, %v1909_v27, 0.0  ;;  %v913_v28 = vpop.permute.xlu0 %912 }
 0x27c   : > { %v1012_v24 = vsel %vm724_vm10, %v1911_v13, 0.0  ;;  %v938_v41 = vsub.f32 %v2341_v43, %v913_v28  ;;  %v1913_v36 = vpop.eup %1912  ;;  %v1129_v28 = vld [vmem:[#allocation4 + $0x58] sm:$0xff] }
 0x27e   : > { %v967_v39 = vmul.f32 1.442695, %v938_v41 }
 0x27f   : > { %1043 = vadd.xlane.f32.xlu0 %v1016_v37  ;;  %1037 = vadd.xlane.f32.xlu1 %v1013_v48  ;;  %v1915_v42 = vpop.eup %1914  ;;  %v817_v48 = vmul.f32 1.442695, %v2991_v8 }
 0x280   : > { %1920 = vpow2.f32 %v967_v39  ;;  %v1917_v18 = vpop.eup %1916  ;;  %v1020_v56 = vsel %vm732_vm2, %v1915_v42, 0.0 }
 0x281   : > { %v1017_v16 = vsel %vm729_vm14, %v1917_v18, 0.0  ;;  %1922 = vpow2.f32 %v817_v48  ;;  %v1056_v48 = vld [vmem:[#allocation3 + $0x18] sm:$0xff] }
 0x283   : > { %1023 = vadd.xlane.f32.xlu0 %v1006_v33  ;;  %975 = vadd.xlane.f32.xlu1 %v1901_v30  ;;  %v1919_v29 = vpop.eup %1918  ;;  %v1019_v30 = vsel %vm731_vm15, %v1913_v36, 0.0  ;;  %v2992_v33 = vsub.f32 %v2385_v63, %v2399_v4  ;;  %v2996_v63 = vsub.f32 %v2411_v9, %v2422_v14 }
 0x284   : > { %v1010_v54 = vsel %vm722_vm13, %v1919_v29, 0.0 }
 0x285   : > { %v833_v5 = vmul.f32 1.442695, %v2992_v33  ;;  %v835_v4 = vmul.f32 1.442695, %v2996_v63  ;;  %v1053_v33 = vld [vmem:[#allocation3] sm:$0xff] }
 0x286   : > { %v1061_v63 = vld [vmem:[#allocation3 + $0x40] sm:$0xff] }
 0x287   : > { %1039 = vadd.xlane.f32.xlu0 %v1014_v0  ;;  %985 = vadd.xlane.f32.xlu1 %v1905_v38  ;;  %v813_v38 = vmul.f32 1.442695, %v2993_v61  ;;  %1924 = vpow2.f32 %v833_v5  ;;  %v2998_v0 = vsub.f32 %v2424_v15, %v2439_v20  ;;  %v3000_v5 = vsub.f32 %v2451_v25, %v2462_v46  ;;  %v3002_v25 = vld [vmem:[#allocation5_spill] sm:$0xff]  ;;  %v3003_v46 = vld [vmem:[#allocation6_spill] sm:$0xff] }
 0x289   : > { %1926 = vpow2.f32 %v813_v38  ;;  %v815_v39 = vmul.f32 1.442695, %v2998_v0  ;;  %v827_v61 = vmul.f32 1.442695, %v3000_v5  ;;  %v1124_v0 = vld [vmem:[#allocation4 + $0x30] sm:$0xff] }
 0x28a   : > { %v1921_v43 = vpop.eup %1920 }
 0x28b   : > { %987 = vadd.xlane.f32.xlu0 %v1911_v13  ;;  %1001 = vadd.xlane.f32.xlu1 %v1913_v36  ;;  %v1018_v59 = vsel %vm730_vm0, %v1921_v43, 0.0  ;;  %v1923_v60 = vpop.eup %1922 }
 0x28c   : > { %v1136_v58 = vmul.f32 %v1923_v60, %v1120_v49  ;;  %v1064_v49 = vld [vmem:[#allocation3 + $0x58] sm:$0xff] }
 0x28f   : > { %1003 = vadd.xlane.f32.xlu0 %v1915_v42  ;;  %981 = vadd.xlane.f32.xlu1 %v1909_v27  ;;  %v1071_v42 = vmul.f32 %v1923_v60, %v1055_v19 }
 0x291   : > { %v1925_v62 = vpop.eup %1924 }
 0x292   : > { %v1144_v7 = vmul.f32 %v1925_v62, %v1128_v21 }
 0x293   : > { %983 = vadd.xlane.f32.xlu0 %v1919_v29  ;;  %997 = vadd.xlane.f32.xlu1 %v1917_v18  ;;  %v1927_v12 = vpop.eup %1926 }
 0x294   : > { %v1134_v14 = vmul.f32 %v1927_v12, %v1118_v51  ;;  %v1069_v53 = vmul.f32 %v1927_v12, %v1053_v33  ;;  %v1054_v51 = vld [vmem:[#allocation3 + $0x8] sm:$0xff] }
 0x297   : > { %999 = vadd.xlane.f32.xlu0 %v1921_v43  ;;  %1033 = vadd.xlane.f32.xlu1 %v1011_v40  ;;  %v2994_v40 = vsub.f32 %v2392_v1, %v2402_v6  ;;  %v2997_v1 = vsub.f32 %v2431_v17, %v2442_v22 }
 0x299   : > { %v819_v32 = vmul.f32 1.442695, %v2994_v40  ;;  %v831_v6 = vmul.f32 1.442695, %v2997_v1 }
 0x29b   : > { %1035 = vadd.xlane.f32.xlu0 %v1012_v24  ;;  %1029 = vadd.xlane.f32.xlu1 %v1009_v3  ;;  %1928 = vpow2.f32 %v819_v32  ;;  %v1126_v24 = vld [vmem:[#allocation4 + $0x40] sm:$0xff] }
 0x29c   : > { %1930 = vpow2.f32 %v829_v57 }
 0x29d   : > { %1932 = vpow2.f32 %v835_v4  ;;  %v3004_v4 = vsub.f32 %v3002_v25, %v3003_v46 }
 0x29e   : > { %1934 = vpow2.f32 %v831_v6 }
 0x29f   : > { %1031 = vadd.xlane.f32.xlu0 %v1010_v54  ;;  %1045 = vadd.xlane.f32.xlu1 %v1017_v16  ;;  %v1063_v54 = vld [vmem:[#allocation3 + $0x50] sm:$0xff]  ;;  %1936 = vpow2.f32 %v815_v39 }
 0x2a3   : > { %1049 = vadd.xlane.f32.xlu1 %v1019_v30  ;;  %1047 = vadd.xlane.f32.xlu0 %v1018_v59  ;;  %v2999_v30 = vsub.f32 %v2444_v23, %v2459_v44  ;;  %v1079_v59 = vmul.f32 %v1925_v62, %v1063_v54  ;;  %v3001_v23 = vsub.f32 %v2464_v47, %v2479_v11  ;;  %v3005_v47 = vld [vmem:[#allocation7_spill] sm:$0xff]  ;;  %v3006_v11 = vld [vmem:[#allocation9_spill] sm:$0xff] }
 0x2a4   : > { %v3007_v21 = vsub.f32 %v3005_v47, %v3006_v11 }
 0x2a5   : > { %v1929_v9 = vpop.eup %1928  ;;  %v825_v15 = vmul.f32 1.442695, %v2999_v30  ;;  %v841_v44 = vmul.f32 1.442695, %v3001_v23  ;;  %v1133_v23 = vld [vmem:[#allocation4 + $0x78] sm:$0xff] }
 0x2a6   : > { %v1931_v55 = vpop.eup %1930  ;;  %v1137_v17 = vmul.f32 %v1929_v9, %v1121_v45  ;;  %v1072_v32 = vmul.f32 %v1929_v9, %v1056_v48  ;;  %v3008_v9 = vld [vmem:[#allocation8_spill] sm:$0xff] }
 0x2a7   : > { %1051 = vadd.xlane.f32.xlu0 %v1020_v56  ;;  %v1142_v22 = vmul.f32 %v1931_v55, %v1126_v24  ;;  %v1933_v52 = vpop.eup %1932  ;;  %1938 = vpow2.f32 %v825_v15  ;;  %v1077_v6 = vmul.f32 %v1931_v55, %v1061_v63 }
 0x2a8   : > { %v1145_v36 = vmul.f32 %v1933_v52, %v1129_v28  ;;  %v2630_v18 = vpop.eup %1934  ;;  %1940 = vpow2.f32 %v827_v61  ;;  %v1080_v1 = vmul.f32 %v1933_v52, %v1064_v49 }
 0x2a9   : > { %v1143_v20 = vmul.f32 %v2630_v18, %v1127_v2  ;;  %1942 = vpow2.f32 %v841_v44  ;;  %v1122_v44 = vld [vmem:[#allocation4 + $0x20] sm:$0xff] }
 0x2f0   : > { %v978_v31 = vpop.xlane.xlu0 %977 }
 0x2f1   : > { %v1152_v27 = vadd.f32 %v1136_v58, %v978_v31  ;;  %v843_v58 = vmul.f32 1.442695, %v3004_v4  ;;  %v1123_v4 = vld [vmem:[#allocation4 + $0x28] sm:$0xff] }
 0x2f3   : > { %1168 = vst.msk [vmem:[#allocation4 + $0x10] sm:$0xff] %vm1101_vm1, %v1152_v27  ;;  %v821_v27 = vmul.f32 1.442695, %v3007_v21  ;;  %1944 = vpow2.f32 %v843_v58  ;;  %v1130_v58 = vld [vmem:[#allocation4 + $0x60] sm:$0xff] }
 0x2f4   : > { %v994_v13 = vpop.xlane.xlu1 %993 }
 0x2f5   : > { %v1160_v3 = vadd.f32 %v1144_v7, %v994_v13  ;;  %v1937_v7 = vpop.eup %1936  ;;  %1946 = vpow2.f32 %v821_v27 }
 0x2f6   : > { %v1070_v55 = vmul.f32 %v1937_v7, %v1054_v51  ;;  %v1939_v28 = vpop.eup %1938 }
 0x2f7   : > { %1176 = vst.msk [vmem:[#allocation4 + $0x50] sm:$0xff] %vm1101_vm1, %v1160_v3  ;;  %v1119_v3 = vld [vmem:[#allocation4 + $0x8] sm:$0xff]  ;;  %v1941_v54 = vpop.eup %1940 }
 0x2f8   : > { %v974_v34 = vpop.xlane.xlu0 %973  ;;  %v1135_v52 = vmul.f32 %v1937_v7, %v1119_v3  ;;  %v2668_v30 = vpop.eup %1942  ;;  %v1059_v7 = vld [vmem:[#allocation3 + $0x30] sm:$0xff] }
 0x2f9   : > { %v1150_v37 = vadd.f32 %v1134_v14, %v974_v34  ;;  %v3009_v14 = vld [vmem:[#allocation10_spill] sm:$0xff]  ;;  %v1075_v3 = vmul.f32 %v1939_v28, %v1059_v7 }
 0x2fa   : > { %v3010_v34 = vsub.f32 %v3008_v9, %v3009_v14 }
 0x2fb   : > { %1166 = vst.msk [vmem:[#allocation4] sm:$0xff] %vm1101_vm1, %v1150_v37 }
 0x2fc   : > { %v980_v50 = vpop.xlane.xlu0 %979  ;;  %v990_v10 = vpop.xlane.xlu1 %989  ;;  %v823_v45 = vmul.f32 1.442695, %v3010_v34  ;;  %v1060_v34 = vld [vmem:[#allocation3 + $0x38] sm:$0xff] }
 0x2fd   : > { %v1153_v35 = vadd.f32 %v1137_v17, %v980_v50  ;;  %v1158_v41 = vadd.f32 %v1142_v22, %v990_v10  ;;  %v3011_v17 = vld [vmem:[#allocation11_spill] sm:$0xff]  ;;  %v3012_v22 = vld [vmem:[#allocation13_spill] sm:$0xff]  ;;  %v2670_v33 = vpop.eup %1944 }
 0x2fe   : > { %v3013_v50 = vsub.f32 %v3011_v17, %v3012_v22  ;;  %1948 = vpow2.f32 %v823_v45  ;;  %v1057_v45 = vld [vmem:[#allocation3 + $0x20] sm:$0xff]  ;;  %v1076_v17 = vmul.f32 %v1941_v54, %v1060_v34  ;;  %v1208_v34 = vld [vmem:[#allocation2 + $0x30] sm:$0xff] (!%p1762_p9) }
 0x2ff   : > { %1169 = vst.msk [vmem:[#allocation4 + $0x18] sm:$0xff] %vm1101_vm1, %v1153_v35  ;;  %1174 = vst.msk [vmem:[#allocation4 + $0x40] sm:$0xff] %vm1101_vm1, %v1158_v41  ;;  %v1062_v41 = vld [vmem:[#allocation3 + $0x48] sm:$0xff] }
 0x300   : > { %v996_v29 = vpop.xlane.xlu0 %995  ;;  %v1026_v43 = vpop.xlane.xlu1 %1025  ;;  %v837_v10 = vmul.f32 1.442695, %v3013_v50 }
 0x301   : > { %v1161_v16 = vadd.f32 %v1145_v36, %v996_v29  ;;  %v1087_v26 = vadd.f32 %v1071_v42, %v1026_v43  ;;  %v3014_v42 = vld [vmem:[#allocation12_spill] sm:$0xff]  ;;  %v3015_v29 = vld [vmem:[#allocation14_spill] sm:$0xff] }
 0x302   : > { %1950 = vpow2.f32 %v837_v10  ;;  %v3016_v43 = vsub.f32 %v3014_v42, %v3015_v29  ;;  %v1067_v42 = vld [vmem:[#allocation3 + $0x70] sm:$0xff] }
 0x303   : > { %1177 = vst.msk [vmem:[#allocation4 + $0x58] sm:$0xff] %vm1101_vm1, %v1161_v16  ;;  %1104 = vst.msk [vmem:[#allocation3 + $0x10] sm:$0xff] %vm1101_vm1, %v1087_v26  ;;  %v1078_v16 = vmul.f32 %v2630_v18, %v1062_v41  ;;  %v1140_v26 = vmul.f32 %v1939_v28, %v1124_v0  ;;  %v1947_v18 = vpop.eup %1946 }
 0x304   : > { %v992_v56 = vpop.xlane.xlu0 %991  ;;  %v1042_v8 = vpop.xlane.xlu1 %1041  ;;  %v839_v2 = vmul.f32 1.442695, %v3016_v43  ;;  %v1138_v49 = vmul.f32 %v1947_v18, %v1122_v44  ;;  %v1073_v22 = vmul.f32 %v1947_v18, %v1057_v45 }
 0x305   : > { %v1159_v38 = vadd.f32 %v1143_v20, %v992_v56  ;;  %v1095_v40 = vadd.f32 %v1079_v59, %v1042_v8  ;;  %v1125_v59 = vld [vmem:[#allocation4 + $0x38] sm:$0xff]  ;;  %v1132_v56 = vld [vmem:[#allocation4 + $0x70] sm:$0xff] }
 0x306   : > { %1952 = vpow2.f32 %v839_v2  ;;  %v1141_v5 = vmul.f32 %v1941_v54, %v1125_v59  ;;  %v1148_v61 = vmul.f32 %v2668_v30, %v1132_v56  ;;  %v1083_v54 = vmul.f32 %v2668_v30, %v1067_v42  ;;  %v1218_v30 = vld [vmem:[%s2220_s30] sm:$0xff] (!%p1762_p9) }
 0x307   : > { %1175 = vst.msk [vmem:[#allocation4 + $0x48] sm:$0xff] %vm1101_vm1, %v1159_v38  ;;  %1112 = vst.msk [vmem:[#allocation3 + $0x50] sm:$0xff] %vm1101_vm1, %v1095_v40  ;;  %v2710_v42 = vld [vmem:[#allocation2 + $0x40] sm:$0xff] (!%p1762_p9) }
 0x308   : > { %v1028_v57 = vpop.xlane.xlu0 %1027  ;;  %v1022_v60 = vpop.xlane.xlu1 %1021 }
 0x309   : > { %v1088_v62 = vadd.f32 %v1072_v32, %v1028_v57  ;;  %v1085_v31 = vadd.f32 %v1069_v53, %v1022_v60  ;;  %v1949_v57 = vpop.eup %1948  ;;  %v1149_v60 = vmul.f32 %v2670_v33, %v1133_v23 }
 0x30a   : > { %v1139_v47 = vmul.f32 %v1949_v57, %v1123_v4  ;;  %v1221_v4 = vld [vmem:[%s2220_s30 + $0x18] sm:$0xff] (!%p1762_p9) }
 0x30b   : > { %1105 = vst.msk [vmem:[#allocation3 + $0x18] sm:$0xff] %vm1101_vm1, %v1088_v62  ;;  %1102 = vst.msk [vmem:[#allocation3] sm:$0xff] %vm1101_vm1, %v1085_v31 }
 0x30c   : > { %v1044_v12 = vpop.xlane.xlu0 %1043  ;;  %v1038_v13 = vpop.xlane.xlu1 %1037 }
 0x30d   : > { %v1096_v24 = vadd.f32 %v1080_v1, %v1044_v12  ;;  %v1093_v37 = vadd.f32 %v1077_v6, %v1038_v13  ;;  %v1951_v63 = vpop.eup %1950  ;;  %v1131_v6 = vld [vmem:[#allocation4 + $0x68] sm:$0xff] }
 0x30e   : > { %v1146_v11 = vmul.f32 %v1951_v63, %v1130_v58 }
 0x30f   : > { %1113 = vst.msk [vmem:[#allocation3 + $0x58] sm:$0xff] %vm1101_vm1, %v1096_v24  ;;  %1110 = vst.msk [vmem:[#allocation3 + $0x40] sm:$0xff] %vm1101_vm1, %v1093_v37 }
 0x310   : > { %v1024_v19 = vpop.xlane.xlu0 %1023  ;;  %v976_v35 = vpop.xlane.xlu1 %975 }
 0x311   : > { %v1086_v39 = vadd.f32 %v1070_v55, %v1024_v19  ;;  %v1151_v36 = vadd.f32 %v1135_v52, %v976_v35  ;;  %v1953_v21 = vpop.eup %1952  ;;  %v1058_v55 = vld [vmem:[#allocation3 + $0x28] sm:$0xff]  ;;  %v1065_v52 = vld [vmem:[#allocation3 + $0x60] sm:$0xff] }
 0x312   : > { %v1147_v51 = vmul.f32 %v1953_v21, %v1131_v6  ;;  %v1074_v28 = vmul.f32 %v1949_v57, %v1058_v55  ;;  %v1081_v41 = vmul.f32 %v1951_v63, %v1065_v52  ;;  %v1225_v55 = vld [vmem:[%s2220_s30 + $0x38] sm:$0xff] (!%p1762_p9)  ;;  %v2703_v52 = vld [vmem:[%s2215_s22] sm:$0xff] (!%p1762_p9) }
 0x313   : > { %1103 = vst.msk [vmem:[#allocation3 + $0x8] sm:$0xff] %vm1101_vm1, %v1086_v39  ;;  %1167 = vst.msk [vmem:[#allocation4 + $0x8] sm:$0xff] %vm1101_vm1, %v1151_v36  ;;  %v1066_v36 = vld [vmem:[#allocation3 + $0x68] sm:$0xff]  ;;  %vm1442_vm3 = vcmp.gt.f32.partialorder (!%p1762_p9), %v2703_v52, 0.5 }
 0x314   : > { %v1040_v15 = vpop.xlane.xlu0 %1039  ;;  %v986_v20 = vpop.xlane.xlu1 %985  ;;  %v1082_v2 = vmul.f32 %v1953_v21, %v1066_v36 }
 0x315   : > { %v1094_v8 = vadd.f32 %v1078_v16, %v1040_v15  ;;  %v1156_v48 = vadd.f32 %v1140_v26, %v986_v20  ;;  %v1068_v15 = vld [vmem:[#allocation3 + $0x78] sm:$0xff] }
 0x316   : > { %v1084_v56 = vmul.f32 %v2670_v33, %v1068_v15  ;;  %v1316_v15 = vld [vmem:[#allocation4 + $0x10] sm:$0xff] (!%p1762_p9) }
 0x317   : > { %1111 = vst.msk [vmem:[#allocation3 + $0x48] sm:$0xff] %vm1101_vm1, %v1094_v8  ;;  %1172 = vst.msk [vmem:[#allocation4 + $0x30] sm:$0xff] %vm1101_vm1, %v1156_v48 }
 0x318   : > { %v988_v38 = vpop.xlane.xlu0 %987  ;;  %v1002_v40 = vpop.xlane.xlu1 %1001 }
 0x319   : > { %v1157_v32 = vadd.f32 %v1141_v5, %v988_v38  ;;  %v1164_v53 = vadd.f32 %v1148_v61, %v1002_v40  ;;  %v1202_v5 = vld [vmem:[#allocation2] sm:$0xff] (!%p1762_p9)  ;;  %v1203_v38 = vld [vmem:[#allocation2 + $0x8] sm:$0xff] (!%p1762_p9) }
 0x31a   : > { %v1234_v61 = vsub.f32 (!%p1762_p9), %v1218_v30, %v1202_v5  ;;  %v1346_v18 = vsub.f32 (!%p1762_p9), 0.0, %v1202_v5  ;;  %v1219_v40 = vld [vmem:[%s2220_s30 + $0x8] sm:$0xff] (!%p1762_p9)  ;;  %v1347_v23 = vsub.f32 (!%p1762_p9), 0.0, %v1203_v38 }
 0x31b   : > { %1173 = vst.msk [vmem:[#allocation4 + $0x38] sm:$0xff] %vm1101_vm1, %v1157_v32  ;;  %1180 = vst.msk [vmem:[#allocation4 + $0x70] sm:$0xff] %vm1101_vm1, %v1164_v53  ;;  %v1235_v32 = vsub.f32 (!%p1762_p9), %v1219_v40, %v1203_v38  ;;  %v1204_v53 = vld [vmem:[#allocation2 + $0x10] sm:$0xff] (!%p1762_p9)  ;;  %v1317_v38 = vld [vmem:[#allocation4 + $0x18] sm:$0xff] (!%p1762_p9) }
 0x31c   : > { %v1004_v25 = vpop.xlane.xlu0 %1003  ;;  %v982_v46 = vpop.xlane.xlu1 %981  ;;  %v1250_v44 = vmul.f32 (!%p1762_p9), 1.442695, %v1234_v61  ;;  %v1362_v33 = vmul.f32 (!%p1762_p9), 1.442695, %v1346_v18  ;;  %v1364_v57 = vmul.f32 (!%p1762_p9), 1.442695, %v1347_v23 }
 0x31d   : > { %v1165_v62 = vadd.f32 %v1149_v60, %v1004_v25  ;;  %v1154_v31 = vadd.f32 %v1138_v49, %v982_v46  ;;  %v1220_v60 = vld [vmem:[%s2220_s30 + $0x10] sm:$0xff] (!%p1762_p9)  ;;  %v1252_v49 = vmul.f32 (!%p1762_p9), 1.442695, %v1235_v32  ;;  %v1348_v25 = vsub.f32 (!%p1762_p9), 0.0, %v1204_v53  ;;  %v1205_v46 = vld [vmem:[#allocation2 + $0x18] sm:$0xff] (!%p1762_p9)  ;;  %v2729_v40 = vld [vmem:[%s2215_s22 + $0x20] sm:$0xff] (!%p1762_p9) }
 0x31e   : > { %1954 = vpow2.f32 (!%p1762_p9), %v1250_v44  ;;  %v1236_v63 = vsub.f32 (!%p1762_p9), %v1220_v60, %v1204_v53  ;;  %v1237_v58 = vsub.f32 (!%p1762_p9), %v1221_v4, %v1205_v46  ;;  %v2732_v23 = vld [vmem:[%s2215_s22 + $0x28] sm:$0xff] (!%p1762_p9)  ;;  %vm1446_vm7 = vcmp.gt.f32.partialorder (!%p1762_p9), %v2729_v40, 0.5 }
 0x31f   : > { %1181 = vst.msk [vmem:[#allocation4 + $0x78] sm:$0xff] %vm1101_vm1, %v1165_v62  ;;  %1170 = vst.msk [vmem:[#allocation4 + $0x20] sm:$0xff] %vm1101_vm1, %v1154_v31  ;;  %1956 = vpow2.f32 (!%p1762_p9), %v1362_v33  ;;  %v1349_v62 = vsub.f32 (!%p1762_p9), 0.0, %v1205_v46  ;;  %v2742_v46 = vld [vmem:[%s2215_s22 + $0x30] sm:$0xff] (!%p1762_p9)  ;;  %vm1447_vm8 = vcmp.gt.f32.partialorder (!%p1762_p9), %v2732_v23, 0.5 }
 0x320   : > { %v984_v27 = vpop.xlane.xlu0 %983  ;;  %v998_v1 = vpop.xlane.xlu1 %997  ;;  %1958 = vpow2.f32 (!%p1762_p9), %v1252_v49  ;;  %v1254_v31 = vmul.f32 (!%p1762_p9), 1.442695, %v1236_v63  ;;  %v1256_v21 = vmul.f32 (!%p1762_p9), 1.442695, %v1237_v58  ;;  %vm1448_vm9 = vcmp.gt.f32.partialorder (!%p1762_p9), %v2742_v46, 0.5 }
 0x321   : > { %v1155_v12 = vadd.f32 %v1139_v47, %v984_v27  ;;  %v1162_v13 = vadd.f32 %v1146_v11, %v998_v1  ;;  %v1366_v47 = vmul.f32 (!%p1762_p9), 1.442695, %v1348_v25  ;;  %v1206_v11 = vld [vmem:[#allocation2 + $0x20] sm:$0xff] (!%p1762_p9)  ;;  %1960 = vpow2.f32 (!%p1762_p9), %v1364_v57 }
 0x322   : > { %v1368_v27 = vmul.f32 (!%p1762_p9), 1.442695, %v1349_v62  ;;  %v1222_v1 = vld [vmem:[%s2220_s30 + $0x20] sm:$0xff] (!%p1762_p9)  ;;  %1962 = vpow2.f32 (!%p1762_p9), %v1254_v31  ;;  %v1350_v7 = vsub.f32 (!%p1762_p9), 0.0, %v1206_v11  ;;  %v1283_v31 = vld [vmem:[#allocation3 + $0x8] sm:$0xff] (!%p1762_p9) }
 0x323   : > { %1171 = vst.msk [vmem:[#allocation4 + $0x28] sm:$0xff] %vm1101_vm1, %v1155_v12  ;;  %1178 = vst.msk [vmem:[#allocation4 + $0x60] sm:$0xff] %vm1101_vm1, %v1162_v13  ;;  %v1238_v6 = vsub.f32 (!%p1762_p9), %v1222_v1, %v1206_v11  ;;  %v1207_v12 = vld [vmem:[#allocation2 + $0x28] sm:$0xff] (!%p1762_p9)  ;;  %1964 = vpow2.f32 (!%p1762_p9), %v1366_v47  ;;  %v1282_v57 = vld [vmem:[#allocation3] sm:$0xff] (!%p1762_p9) }
 0x324   : > { %v1000_v9 = vpop.xlane.xlu0 %999  ;;  %v1034_v14 = vpop.xlane.xlu1 %1033  ;;  %v1223_v13 = vld [vmem:[%s2220_s30 + $0x28] sm:$0xff] (!%p1762_p9)  ;;  %1966 = vpow2.f32 (!%p1762_p9), %v1256_v21  ;;  %v1284_v11 = vld [vmem:[#allocation3 + $0x10] sm:$0xff] (!%p1762_p9) }
 0x325   : > { %v1163_v24 = vadd.f32 %v1147_v51, %v1000_v9  ;;  %v1091_v37 = vadd.f32 %v1075_v3, %v1034_v14  ;;  %v1351_v51 = vsub.f32 (!%p1762_p9), 0.0, %v1207_v12  ;;  %v1258_v3 = vmul.f32 (!%p1762_p9), 1.442695, %v1238_v6 }
 0x326   : > { %v1370_v9 = vmul.f32 (!%p1762_p9), 1.442695, %v1350_v7  ;;  %v1239_v14 = vsub.f32 (!%p1762_p9), %v1223_v13, %v1207_v12  ;;  %1968 = vpow2.f32 (!%p1762_p9), %v1368_v27  ;;  %v1318_v25 = vld [vmem:[#allocation4 + $0x20] sm:$0xff] (!%p1762_p9)  ;;  %v1354_v6 = vsub.f32 (!%p1762_p9), 0.0, %v2710_v42  ;;  %v1285_v13 = vld [vmem:[#allocation3 + $0x18] sm:$0xff] (!%p1762_p9) }
 0x327   : > { %1179 = vst.msk [vmem:[#allocation4 + $0x68] sm:$0xff] %vm1101_vm1, %v1163_v24  ;;  %1108 = vst.msk [vmem:[#allocation3 + $0x30] sm:$0xff] %vm1101_vm1, %v1091_v37  ;;  %v1372_v45 = vmul.f32 (!%p1762_p9), 1.442695, %v1351_v51  ;;  %v1224_v24 = vld [vmem:[%s2220_s30 + $0x30] sm:$0xff] (!%p1762_p9)  ;;  %v1314_v37 = vld [vmem:[#allocation4] sm:$0xff] (!%p1762_p9)  ;;  %1970 = vpow2.f32 (!%p1762_p9), %v1258_v3 }
 0x328   : > { %v1036_v50 = vpop.xlane.xlu0 %1035  ;;  %v1030_v10 = vpop.xlane.xlu1 %1029  ;;  %1972 = vpow2.f32 (!%p1762_p9), %v1370_v9 }
 0x329   : > { %v1092_v19 = vadd.f32 %v1076_v17, %v1036_v50  ;;  %v1089_v35 = vadd.f32 %v1073_v22, %v1030_v10  ;;  %v1260_v17 = vmul.f32 (!%p1762_p9), 1.442695, %v1239_v14  ;;  %v1240_v22 = vsub.f32 (!%p1762_p9), %v1224_v24, %v1208_v34  ;;  %v1209_v10 = vld [vmem:[#allocation2 + $0x38] sm:$0xff] (!%p1762_p9)  ;;  %v1320_v24 = vld [vmem:[#allocation4 + $0x30] sm:$0xff] (!%p1762_p9) }
 0x32a   : > { %v1352_v50 = vsub.f32 (!%p1762_p9), 0.0, %v1208_v34  ;;  %v1319_v1 = vld [vmem:[#allocation4 + $0x28] sm:$0xff] (!%p1762_p9) }
 0x32b   : > { %1109 = vst.msk [vmem:[#allocation3 + $0x38] sm:$0xff] %vm1101_vm1, %v1092_v19  ;;  %1106 = vst.msk [vmem:[#allocation3 + $0x20] sm:$0xff] %vm1101_vm1, %v1089_v35  ;;  %v1315_v19 = vld [vmem:[#allocation4 + $0x8] sm:$0xff] (!%p1762_p9)  ;;  %v1241_v35 = vsub.f32 (!%p1762_p9), %v1225_v55, %v1209_v10  ;;  %1974 = vpow2.f32 (!%p1762_p9), %v1260_v17  ;;  %v2760_v55 = vld [vmem:[%s2215_s22 + $0x38] sm:$0xff] (!%p1762_p9) }
 0x32c   : > { %v1032_v0 = vpop.xlane.xlu0 %1031  ;;  %v1046_v39 = vpop.xlane.xlu1 %1045  ;;  %v1374_v36 = vmul.f32 (!%p1762_p9), 1.442695, %v1352_v50  ;;  %1976 = vpow2.f32 (!%p1762_p9), %v1372_v45  ;;  %vm1449_vm10 = vcmp.gt.f32.partialorder (!%p1762_p9), %v2760_v55, 0.5 }
 0x32d   : > { %v1090_v29 = vadd.f32 %v1074_v28, %v1032_v0  ;;  %v1097_v43 = vadd.f32 %v1081_v41, %v1046_v39  ;;  %v1353_v28 = vsub.f32 (!%p1762_p9), 0.0, %v1209_v10  ;;  %v2705_v41 = vpop.eup (!%p1762_p9), %1954  ;;  %v2708_v0 = vld [vmem:[%s2215_s22 + $0x8] sm:$0xff] (!%p1762_p9)  ;;  %v1262_v39 = vmul.f32 (!%p1762_p9), 1.442695, %v1240_v22 }
 0x32e   : > { %vm1443_vm4 = vcmp.gt.f32.partialorder (!%p1762_p9), %v2708_v0, 0.5  ;;  %v1298_v12 = vsub.f32 (!%p1762_p9), %v1282_v57, %v2705_v41 }
 0x32f   : > { %1107 = vst.msk [vmem:[#allocation3 + $0x28] sm:$0xff] %vm1101_vm1, %v1090_v29  ;;  %1114 = vst.msk [vmem:[#allocation3 + $0x60] sm:$0xff] %vm1101_vm1, %v1097_v43  ;;  %v1957_v29 = vpop.eup (!%p1762_p9), %1956  ;;  %v1330_v43 = vsub.f32 (!%p1762_p9), %v1314_v37, %v2705_v41  ;;  %1978 = vpow2.f32 (!%p1762_p9), %v1262_v39  ;;  %v1378_v37 = vmul.f32 (!%p1762_p9), 1.442695, %v1354_v6  ;;  %v1321_v39 = vld [vmem:[#allocation4 + $0x38] sm:$0xff] (!%p1762_p9) }
 0x330   : > { %v1048_v16 = vpop.xlane.xlu0 %1047  ;;  %v1050_v26 = vpop.xlane.xlu1 %1049  ;;  %1980 = vpow2.f32 (!%p1762_p9), %v1374_v36 }
 0x331   : > { %v1098_v20 = vadd.f32 %v1082_v2, %v1048_v16  ;;  %v1099_v59 = vadd.f32 %v1083_v54, %v1050_v26  ;;  %1201 = sbr.rel (%p1762_p9) target bundleno = 912 (0x390), region = 52  ;;  %v1264_v2 = vmul.f32 (!%p1762_p9), 1.442695, %v1241_v35  ;;  %v1226_v54 = vld [vmem:[%s2220_s30 + $0x40] sm:$0xff] (!%p1762_p9)  ;;  %v2714_v16 = vpop.eup (!%p1762_p9), %1958  ;;  %v1394_v26 = vmul.f32 (!%p1762_p9), 6.0, %v1957_v29 }
 0x332   : > { %v1331_v5 = vsub.f32 (!%p1762_p9), %v1315_v19, %v2714_v16  ;;  %v1286_v34 = vld [vmem:[#allocation3 + $0x20] sm:$0xff] (!%p1762_p9)  ;;  %v1299_v22 = vsub.f32 (!%p1762_p9), %v1283_v31, %v2714_v16 }
 0x333   : > { %1115 = vst.msk [vmem:[#allocation3 + $0x68] sm:$0xff] %vm1101_vm1, %v1098_v20  ;;  %1116 = vst.msk [vmem:[#allocation3 + $0x70] sm:$0xff] %vm1101_vm1, %v1099_v59  ;;  %v2717_v20 = vld [vmem:[%s2215_s22 + $0x10] sm:$0xff] (!%p1762_p9)  ;;  %v2720_v59 = vld [vmem:[%s2215_s22 + $0x18] sm:$0xff] (!%p1762_p9)  ;;  %v1410_v61 = vsub.f32 (!%p1762_p9), %v1330_v43, %v1394_v26  ;;  %1982 = vpow2.f32 (!%p1762_p9), %v1264_v2 }
 0x334   : > { %v1052_v8 = vpop.xlane.xlu0 %1051  ;;  %vm1444_vm5 = vcmp.gt.f32.partialorder (!%p1762_p9), %v2717_v20, 0.5  ;;  %vm1445_vm6 = vcmp.gt.f32.partialorder (!%p1762_p9), %v2720_v59, 0.5  ;;  %v1211_v2 = vld [vmem:[#allocation2 + $0x48] sm:$0xff] (!%p1762_p9) }
 0x335   : > { %v1100_v48 = vadd.f32 %v1084_v56, %v1052_v8  ;;  %v1376_v56 = vmul.f32 (!%p1762_p9), 1.442695, %v1353_v28  ;;  %v1242_v8 = vsub.f32 (!%p1762_p9), %v1226_v54, %v2710_v42  ;;  %v1474_v60 = vsel (!%p1762_p9), %vm1442_vm3, %v1410_v61, 1.0  ;;  %v1227_v54 = vld [vmem:[%s2220_s30 + $0x48] sm:$0xff] (!%p1762_p9) }
 0x337   : > { %1117 = vst.msk [vmem:[#allocation3 + $0x78] sm:$0xff] %vm1101_vm1, %v1100_v48  ;;  %v1961_v48 = vpop.eup (!%p1762_p9), %1960  ;;  %v1266_v44 = vmul.f32 (!%p1762_p9), 1.442695, %v1242_v8  ;;  %1984 = vpow2.f32 (!%p1762_p9), %v1376_v56 }
 0x338   : > { %v2726_v30 = vpop.eup %1962  ;;  %v1395_v18 = vmul.f32 6.0, %v1961_v48  ;;  %v1458_v48 = vsel %vm1442_vm3, %v1298_v12, 1.0 }
 0x339   : > { %v1965_v33 = vpop.eup %1964  ;;  %v1332_v32 = vsub.f32 %v1316_v15, %v2726_v30  ;;  %1986 = vpow2.f32 %v1266_v44  ;;  %v1300_v50 = vsub.f32 %v1284_v11, %v2726_v30  ;;  %v1287_v30 = vld [vmem:[#allocation3 + $0x28] sm:$0xff]  ;;  %v1288_v44 = vld [vmem:[#allocation3 + $0x30] sm:$0xff]  ;;  %v1322_v11 = vld [vmem:[#allocation4 + $0x40] sm:$0xff] }
 0x33a   : > { %v2737_v53 = vpop.eup %1966  ;;  %v1411_v49 = vsub.f32 %v1331_v5, %v1395_v18  ;;  %v1396_v63 = vmul.f32 6.0, %v1965_v33  ;;  %1988 = vrcp.f32 %v1474_v60  ;;  %v1459_v5 = vsel %vm1443_vm4, %v1299_v22, 1.0 }
 0x33b   : > { %v1969_v4 = vpop.eup %1968  ;;  %v1333_v58 = vsub.f32 %v1317_v38, %v2737_v53  ;;  %v1301_v42 = vsub.f32 %v1285_v13, %v2737_v53  ;;  %v1243_v53 = vsub.f32 %v1227_v54, %v1211_v2  ;;  %v1460_v60 = vsel %vm1444_vm5, %v1300_v50, 1.0  ;;  %v1213_v50 = vld [vmem:[#allocation2 + $0x58] sm:$0xff]  ;;  %v1231_v54 = vld [vmem:[%s2220_s30 + $0x68] sm:$0xff] }
 0x33c   : > { %v1971_v62 = vpop.eup %1970  ;;  %v1475_v47 = vsel %vm1443_vm4, %v1411_v49, 1.0  ;;  %v1412_v21 = vsub.f32 %v1332_v32, %v1396_v63  ;;  %v1397_v27 = vmul.f32 6.0, %v1969_v4  ;;  %v1228_v4 = vld [vmem:[%s2220_s30 + $0x50] sm:$0xff] }
 0x33d   : > { %v1973_v7 = vpop.eup %1972  ;;  %1990 = vrcp.f32 %v1475_v47  ;;  %v1334_v51 = vsub.f32 %v1318_v25, %v1971_v62  ;;  %v1302_v29 = vsub.f32 %v1286_v34, %v1971_v62  ;;  %v1461_v49 = vsel %vm1445_vm6, %v1301_v42, 1.0  ;;  %v1212_v25 = vld [vmem:[#allocation2 + $0x50] sm:$0xff] }
 0x33e   : > { %v2752_v3 = vpop.eup %1974  ;;  %v1476_v9 = vsel %vm1444_vm5, %v1412_v21, 1.0  ;;  %v1413_v14 = vsub.f32 %v1333_v58, %v1397_v27  ;;  %v1398_v45 = vmul.f32 6.0, %v1973_v7  ;;  %v1268_v6 = vmul.f32 1.442695, %v1243_v53 }
 0x33f   : > { %v1977_v17 = vpop.eup %1976  ;;  %1992 = vrcp.f32 %v1476_v9  ;;  %v1335_v10 = vsub.f32 %v1319_v1, %v2752_v3  ;;  %v1462_v63 = vsel %vm1446_vm7, %v1302_v29, 1.0  ;;  %v1303_v62 = vsub.f32 %v1287_v30, %v2752_v3  ;;  %v2795_v1 = vld [vmem:[%s2215_s22 + $0x40] sm:$0xff]  ;;  %v1289_v9 = vld [vmem:[#allocation3 + $0x38] sm:$0xff] }
 0x340   : > { %v2762_v19 = vpop.eup %1978  ;;  %v1477_v35 = vsel %vm1445_vm6, %v1413_v14, 1.0  ;;  %v1414_v28 = vsub.f32 %v1334_v51, %v1398_v45  ;;  %v1399_v41 = vmul.f32 6.0, %v1977_v17  ;;  %1994 = vpow2.f32 %v1378_v37  ;;  %v1290_v14 = vld [vmem:[#allocation3 + $0x40] sm:$0xff] }
 0x341   : > { %v1981_v36 = vpop.eup %1980  ;;  %1996 = vrcp.f32 %v1477_v35  ;;  %v1336_v43 = vsub.f32 %v1320_v24, %v2762_v19  ;;  %v1304_v27 = vsub.f32 %v1288_v44, %v2762_v19  ;;  %v1355_v7 = vsub.f32 0.0, %v1211_v2  ;;  %v1215_v2 = vld [vmem:[#allocation2 + $0x68] sm:$0xff] }
 0x342   : > { %v2769_v16 = vpop.eup %1982  ;;  %v1478_v26 = vsel %vm1446_vm7, %v1414_v28, 1.0  ;;  %v1415_v15 = vsub.f32 %v1335_v10, %v1399_v41  ;;  %v1400_v56 = vmul.f32 6.0, %v1981_v36  ;;  %v1244_v51 = vsub.f32 %v1228_v4, %v1212_v25  ;;  %v1229_v10 = vld [vmem:[%s2220_s30 + $0x58] sm:$0xff]  ;;  %v1230_v36 = vld [vmem:[%s2220_s30 + $0x60] sm:$0xff]  ;;  %v1232_v4 = vld [vmem:[%s2220_s30 + $0x70] sm:$0xff] }
 0x343   : > { %v1985_v8 = vpop.eup %1984  ;;  %1998 = vrcp.f32 %v1478_v26  ;;  %v1337_v61 = vsub.f32 %v1321_v39, %v2769_v16  ;;  %v1380_v45 = vmul.f32 1.442695, %v1355_v7  ;;  %v1356_v24 = vsub.f32 0.0, %v1212_v25  ;;  %v1214_v39 = vld [vmem:[#allocation2 + $0x60] sm:$0xff]  ;;  %v1216_v25 = vld [vmem:[#allocation2 + $0x70] sm:$0xff] }
 0x344   : > { %v2779_v18 = vpop.eup %1986  ;;  %v1479_v38 = vsel %vm1447_vm8, %v1415_v15, 1.0  ;;  %v1416_v33 = vsub.f32 %v1336_v43, %v1400_v56  ;;  %v1401_v32 = vmul.f32 6.0, %v1985_v8  ;;  %v1463_v22 = vsel %vm1447_vm8, %v1303_v62, 1.0 }
 0x345   : > { %v1989_v57 = vpop.eup %1988  ;;  %2000 = vrcp.f32 %v1479_v38  ;;  %v1338_v34 = vsub.f32 %v1322_v11, %v2779_v18  ;;  %vm1450_vm11 = vcmp.gt.f32.partialorder %v2795_v1, 0.5  ;;  %v1464_v35 = vsel %vm1448_vm9, %v1304_v27, 1.0  ;;  %v1217_v11 = vld [vmem:[#allocation2 + $0x78] sm:$0xff] }
 0x346   : > { %v1491_v58 = vmul.f32 %v1989_v57, %v1458_v48  ;;  %v1480_v31 = vsel %vm1448_vm9, %v1416_v33, 1.0  ;;  %v1417_v47 = vsub.f32 %v1337_v61, %v1401_v32  ;;  %v1270_v41 = vmul.f32 1.442695, %v1244_v51 }
 0x347   : > { %v1991_v21 = vpop.eup %1990  ;;  %2002 = vrcp.f32 %v1480_v31  ;;  %v1305_v29 = vsub.f32 %v1289_v9, %v2769_v16  ;;  %v1306_v43 = vsub.f32 %v1290_v14, %v2779_v18  ;;  %v1382_v56 = vmul.f32 1.442695, %v1356_v24 }
 0x348   : > { %2004 = vlog2.f32 %v1491_v58  ;;  %v1493_v12 = vmul.f32 %v1991_v21, %v1459_v5  ;;  %v1481_v13 = vsel %vm1449_vm10, %v1417_v47, 1.0  ;;  %v1245_v8 = vsub.f32 %v1229_v10, %v1213_v50  ;;  %v2811_v5 = vld [vmem:[%s2215_s22 + $0x48] sm:$0xff]  ;;  %v1233_v21 = vld [vmem:[%s2220_s30 + $0x78] sm:$0xff] }
 0x349   : > { %v1993_v3 = vpop.eup %1992  ;;  %2006 = vrcp.f32 %v1481_v13  ;;  %v1357_v30 = vsub.f32 0.0, %v1213_v50  ;;  %v1246_v61 = vsub.f32 %v1230_v36, %v1214_v39  ;;  %v1358_v18 = vsub.f32 0.0, %v1214_v39 }
 0x34a   : > { %v1995_v37 = vpop.eup %1994  ;;  %2008 = vlog2.f32 %v1493_v12  ;;  %v1495_v17 = vmul.f32 %v1993_v3, %v1460_v60  ;;  %v1247_v44 = vsub.f32 %v1231_v54, %v1215_v2  ;;  %v1465_v32 = vsel %vm1449_vm10, %v1305_v29, 1.0  ;;  %v1323_v60 = vld [vmem:[#allocation4 + $0x48] sm:$0xff] }
 0x34b   : > { %v1997_v19 = vpop.eup %1996  ;;  %v1402_v28 = vmul.f32 6.0, %v1995_v37  ;;  %2010 = vpow2.f32 %v1268_v6  ;;  %v2819_v53 = vsel %vm1450_vm11, %v1306_v43, 1.0  ;;  %vm1451_vm12 = vcmp.gt.f32.partialorder %v2811_v5, 0.5 }
 0x34c   : > { %2012 = vlog2.f32 %v1495_v17  ;;  %v1497_v42 = vmul.f32 %v1997_v19, %v1461_v49  ;;  %v1272_v49 = vmul.f32 1.442695, %v1245_v8  ;;  %v1384_v31 = vmul.f32 1.442695, %v1357_v30 }
 0x34d   : > { %v1999_v26 = vpop.eup %1998  ;;  %v1418_v15 = vsub.f32 %v1338_v34, %v1402_v28  ;;  %2014 = vpow2.f32 %v1380_v45  ;;  %v1274_v47 = vmul.f32 1.442695, %v1246_v61  ;;  %v1386_v7 = vmul.f32 1.442695, %v1358_v18 }
 0x34e   : > { %2016 = vlog2.f32 %v1497_v42  ;;  %v1499_v48 = vmul.f32 %v1999_v26, %v1462_v63  ;;  %v1359_v63 = vsub.f32 0.0, %v1215_v2  ;;  %v1276_v12 = vmul.f32 1.442695, %v1247_v44  ;;  %v1324_v26 = vld [vmem:[#allocation4 + $0x50] sm:$0xff] }
 0x34f   : > { %v2001_v38 = vpop.eup %2000  ;;  %v1482_v16 = vsel %vm1450_vm11, %v1418_v15, 1.0  ;;  %2018 = vpow2.f32 %v1270_v41  ;;  %v1248_v3 = vsub.f32 %v1232_v4, %v1216_v25  ;;  %v1360_v9 = vsub.f32 0.0, %v1216_v25 }
 0x350   : > { %2020 = vlog2.f32 %v1499_v48  ;;  %v1501_v33 = vmul.f32 %v2001_v38, %v1463_v22  ;;  %v1388_v24 = vmul.f32 1.442695, %v1359_v63  ;;  %v1249_v22 = vsub.f32 %v1233_v21, %v1217_v11  ;;  %v1325_v63 = vld [vmem:[#allocation4 + $0x58] sm:$0xff] }
 0x351   : > { %v2003_v57 = vpop.eup %2002  ;;  %2022 = vrcp.f32 %v1482_v16  ;;  %v1361_v50 = vsub.f32 0.0, %v1217_v11  ;;  %v1278_v36 = vmul.f32 1.442695, %v1248_v3  ;;  %v1390_v42 = vmul.f32 1.442695, %v1360_v9  ;;  %v2837_v16 = vld [vmem:[%s2215_s22 + $0x50] sm:$0xff] }
 0x352   : > { %v2005_v58 = vpop.eup %2004  ;;  %2024 = vlog2.f32 %v1501_v33  ;;  %v1503_v62 = vmul.f32 %v2003_v57, %v1464_v35  ;;  %vm1452_vm13 = vcmp.gt.f32.partialorder %v2837_v16, 0.5 }
 0x353   : > { %v2007_v27 = vpop.eup %2006  ;;  %v1523_v6 = vmul.f32 0.6931472, %v2005_v58  ;;  %2026 = vpow2.f32 %v1382_v56  ;;  %v1280_v56 = vmul.f32 1.442695, %v1249_v22  ;;  %v1392_v8 = vmul.f32 1.442695, %v1361_v50 }
 0x354   : > { %v2009_v13 = vpop.eup %2008  ;;  %2028 = vlog2.f32 %v1503_v62  ;;  %v1505_v51 = vmul.f32 %v2007_v27, %v1465_v32  ;;  %v2855_v27 = vld [vmem:[%s2215_s22 + $0x58] sm:$0xff] }
 0x355   : > { %v2824_v14 = vpop.eup %2010  ;;  %v1554_v34 = vsub.f32 0.0, %v1523_v6  ;;  %v1525_v45 = vmul.f32 0.6931472, %v2009_v13  ;;  %2030 = vpow2.f32 %v1272_v49  ;;  %v1291_v49 = vld [vmem:[#allocation3 + $0x48] sm:$0xff]  ;;  %v1326_v13 = vld [vmem:[#allocation4 + $0x60] sm:$0xff]  ;;  %vm1453_vm14 = vcmp.gt.f32.partialorder %v2855_v27, 0.5 }
 0x356   : > { %v2013_v37 = vpop.eup %2012  ;;  %2032 = vlog2.f32 %v1505_v51  ;;  %v1339_v17 = vsub.f32 %v1323_v60, %v2824_v14 }
 0x357   : > { %v2015_v10 = vpop.eup %2014  ;;  %v1570_v19 = vmul.f32 %v1554_v34, %v2703_v52  ;;  %v1555_v35 = vsub.f32 0.0, %v1525_v45  ;;  %v1527_v28 = vmul.f32 0.6931472, %v2013_v37  ;;  %2034 = vpow2.f32 %v1384_v31  ;;  %v1327_v34 = vld [vmem:[#allocation4 + $0x68] sm:$0xff]  ;;  %v1292_v37 = vld [vmem:[#allocation3 + $0x50] sm:$0xff] }
 0x358   : > { %v2017_v41 = vpop.eup %2016  ;;  %v1403_v39 = vmul.f32 6.0, %v2015_v10  ;;  %2036 = vpow2.f32 %v1274_v47  ;;  %v1307_v47 = vsub.f32 %v1291_v49, %v2824_v14  ;;  %v2865_v14 = vld [vmem:[%s2215_s22 + $0x60] sm:$0xff] }
 0x359   : > { %v2828_v29 = vpop.eup %2018  ;;  %1586 = vst.msk [vmem:[%s2229_s15] sm:$0xff] %vm1101_vm1, %v1570_v19  ;;  %v1571_v43 = vmul.f32 %v1555_v35, %v2708_v0  ;;  %v1556_v2 = vsub.f32 0.0, %v1527_v28  ;;  %v1529_v54 = vmul.f32 0.6931472, %v2017_v41  ;;  %2038 = vpow2.f32 %v1386_v7  ;;  %v2875_v19 = vld [vmem:[%s2215_s22 + $0x68] sm:$0xff] }
 0x35a   : > { %v2021_v52 = vpop.eup %2020  ;;  %v1419_v15 = vsub.f32 %v1339_v17, %v1403_v39  ;;  %2040 = vpow2.f32 %v1276_v12  ;;  %v1340_v33 = vsub.f32 %v1324_v26, %v2828_v29  ;;  %v1467_v28 = vsel %vm1451_vm12, %v1307_v47, 1.0  ;;  %v1328_v39 = vld [vmem:[#allocation4 + $0x70] sm:$0xff] }
 0x35b   : > { %v2023_v48 = vpop.eup %2022  ;;  %1587 = vst.msk [vmem:[%s2229_s15 + $0x8] sm:$0xff] %vm1101_vm1, %v1571_v43  ;;  %v1572_v30 = vmul.f32 %v1556_v2, %v2717_v20  ;;  %v1557_v61 = vsub.f32 0.0, %v1529_v54  ;;  %v1531_v38 = vmul.f32 0.6931472, %v2021_v52  ;;  %2042 = vpow2.f32 %v1388_v24  ;;  %v2890_v26 = vld [vmem:[%s2215_s22 + $0x70] sm:$0xff] }
 0x35c   : > { %v2025_v0 = vpop.eup %2024  ;;  %v1507_v18 = vmul.f32 %v2023_v48, %v2819_v53  ;;  %v1483_v44 = vsel %vm1451_vm12, %v1419_v15, 1.0  ;;  %2044 = vpow2.f32 %v1278_v36  ;;  %vm1454_vm15 = vcmp.gt.f32.partialorder %v2865_v14, 0.5 }
 0x35d   : > { %v2027_v32 = vpop.eup %2026  ;;  %1588 = vst.msk [vmem:[%s2229_s15 + $0x10] sm:$0xff] %vm1101_vm1, %v1572_v30  ;;  %v1573_v20 = vmul.f32 %v1557_v61, %v2720_v59  ;;  %v1558_v57 = vsub.f32 0.0, %v1531_v38  ;;  %v1533_v60 = vmul.f32 0.6931472, %v2025_v0  ;;  %2046 = vrcp.f32 %v1483_v44  ;;  %v1329_v30 = vld [vmem:[#allocation4 + $0x78] sm:$0xff]  ;;  %v1294_v44 = vld [vmem:[#allocation3 + $0x60] sm:$0xff] }
 0x35e   : > { %v2029_v25 = vpop.eup %2028  ;;  %2048 = vlog2.f32 %v1507_v18  ;;  %v1404_v53 = vmul.f32 6.0, %v2027_v32  ;;  %vm1455_vm0 = vcmp.gt.f32.partialorder %v2875_v19, 0.5  ;;  %vm1456_vm2 = vcmp.gt.f32.partialorder %v2890_v26, 0.5 }
 0x35f   : > { %v2847_v4 = vpop.eup %2030  ;;  %1589 = vst.msk [vmem:[%s2229_s15 + $0x18] sm:$0xff] %vm1101_vm1, %v1573_v20  ;;  %v1574_v58 = vmul.f32 %v1558_v57, %v2729_v40  ;;  %v1559_v62 = vsub.f32 0.0, %v1533_v60  ;;  %v1535_v59 = vmul.f32 0.6931472, %v2029_v25  ;;  %2050 = vpow2.f32 %v1390_v42  ;;  %v2904_v20 = vld [vmem:[%s2215_s22 + $0x78] sm:$0xff]  ;;  %v1295_v25 = vld [vmem:[#allocation3 + $0x68] sm:$0xff] }
 0x360   : > { %v2033_v31 = vpop.eup %2032  ;;  %v1420_v11 = vsub.f32 %v1340_v33, %v1404_v53  ;;  %v1341_v21 = vsub.f32 %v1325_v63, %v2847_v4  ;;  %2052 = vpow2.f32 %v1280_v56  ;;  %v1308_v42 = vsub.f32 %v1292_v37, %v2828_v29  ;;  %v1293_v56 = vld [vmem:[#allocation3 + $0x58] sm:$0xff] }
 0x361   : > { %v2035_v6 = vpop.eup %2034  ;;  %1590 = vst.msk [vmem:[%s2229_s15 + $0x20] sm:$0xff] %vm1101_vm1, %v1574_v58  ;;  %v1575_v7 = vmul.f32 %v1559_v62, %v2732_v23  ;;  %v1560_v40 = vsub.f32 0.0, %v1535_v59  ;;  %v1537_v12 = vmul.f32 0.6931472, %v2033_v31  ;;  %2054 = vpow2.f32 %v1392_v8 }
 0x362   : > { %v2860_v51 = vpop.eup %2036  ;;  %v1484_v3 = vsel %vm1452_vm13, %v1420_v11, 1.0  ;;  %v1405_v9 = vmul.f32 6.0, %v2035_v6  ;;  %v1468_v18 = vsel %vm1452_vm13, %v1308_v42, 1.0  ;;  %v1309_v49 = vsub.f32 %v1293_v56, %v2847_v4 }
 0x363   : > { %v2039_v45 = vpop.eup %2038  ;;  %1591 = vst.msk [vmem:[%s2229_s15 + $0x28] sm:$0xff] %vm1101_vm1, %v1575_v7  ;;  %v1576_v23 = vmul.f32 %v1560_v40, %v2742_v46  ;;  %v1561_v24 = vsub.f32 0.0, %v1537_v12  ;;  %2056 = vrcp.f32 %v1484_v3  ;;  %v1342_v50 = vsub.f32 %v1326_v13, %v2860_v51  ;;  %v1296_v7 = vld [vmem:[#allocation3 + $0x70] sm:$0xff] }
 0x364   : > { %v2871_v17 = vpop.eup %2040  ;;  %v1421_v22 = vsub.f32 %v1341_v21, %v1405_v9  ;;  %v1406_v10 = vmul.f32 6.0, %v2039_v45  ;;  %v1310_v31 = vsub.f32 %v1294_v44, %v2860_v51  ;;  %vm1457_vm3 = vcmp.gt.f32.partialorder %v2904_v20, 0.5  ;;  %v1297_v51 = vld [vmem:[#allocation3 + $0x78] sm:$0xff] }
 0x365   : > { %v2043_v35 = vpop.eup %2042  ;;  %1592 = vst.msk [vmem:[%s2229_s15 + $0x30] sm:$0xff] %vm1101_vm1, %v1576_v23  ;;  %v1577_v46 = vmul.f32 %v1561_v24, %v2760_v55  ;;  %v1343_v41 = vsub.f32 %v1327_v34, %v2871_v17  ;;  %v1469_v4 = vsel %vm1453_vm14, %v1309_v49, 1.0  ;;  %v1311_v6 = vsub.f32 %v1295_v25, %v2871_v17 }
 0x366   : > { %v2884_v36 = vpop.eup %2044  ;;  %v1485_v43 = vsel %vm1453_vm14, %v1421_v22, 1.0  ;;  %v1422_v2 = vsub.f32 %v1342_v50, %v1406_v10  ;;  %v1407_v54 = vmul.f32 6.0, %v2043_v35  ;;  %v1470_v12 = vsel %vm1454_vm15, %v1310_v31, 1.0 }
 0x367   : > { %v2047_v55 = vpop.eup %2046  ;;  %1593 = vst.msk [vmem:[%s2229_s15 + $0x38] sm:$0xff] %vm1101_vm1, %v1577_v46  ;;  %2058 = vrcp.f32 %v1485_v43  ;;  %v1344_v48 = vsub.f32 %v1328_v39, %v2884_v36  ;;  %v1471_v9 = vsel %vm1455_vm0, %v1311_v6, 1.0  ;;  %v1312_v34 = vsub.f32 %v1296_v7, %v2884_v36 }
 0x368   : > { %v2049_v52 = vpop.eup %2048  ;;  %v1509_v15 = vmul.f32 %v2047_v55, %v1467_v28  ;;  %v1486_v29 = vsel %vm1454_vm15, %v1422_v2, 1.0  ;;  %v1423_v8 = vsub.f32 %v1343_v41, %v1407_v54 }
 0x369   : > { %v2051_v61 = vpop.eup %2050  ;;  %v1539_v38 = vmul.f32 0.6931472, %v2049_v52  ;;  %2060 = vrcp.f32 %v1486_v29  ;;  %v1472_v10 = vsel %vm1456_vm2, %v1312_v34, 1.0 }
 0x36a   : > { %v2053_v0 = vpop.eup %2052  ;;  %2062 = vlog2.f32 %v1509_v15  ;;  %v1487_v33 = vsel %vm1455_vm0, %v1423_v8, 1.0  ;;  %v1408_v32 = vmul.f32 6.0, %v2051_v61 }
 0x36b   : > { %v2055_v57 = vpop.eup %2054  ;;  %v1562_v60 = vsub.f32 0.0, %v1539_v38  ;;  %2064 = vrcp.f32 %v1487_v33  ;;  %v1345_v63 = vsub.f32 %v1329_v30, %v2053_v0  ;;  %v1313_v17 = vsub.f32 %v1297_v51, %v2053_v0 }
 0x36c   : > { %v1424_v53 = vsub.f32 %v1344_v48, %v1408_v32  ;;  %v1409_v58 = vmul.f32 6.0, %v2055_v57 }
 0x36d   : > { %v2057_v62 = vpop.eup %2056  ;;  %v1578_v59 = vmul.f32 %v1562_v60, %v2795_v1  ;;  %v1473_v28 = vsel %vm1457_vm3, %v1313_v17, 1.0 }
 0x36e   : > { %v1511_v47 = vmul.f32 %v2057_v62, %v1468_v18  ;;  %v1488_v11 = vsel %vm1456_vm2, %v1424_v53, 1.0  ;;  %v1425_v21 = vsub.f32 %v1345_v63, %v1409_v58 }
 0x36f   : > { %1594 = vst.msk [vmem:[%s2229_s15 + $0x40] sm:$0xff] %vm1101_vm1, %v1578_v59  ;;  %2066 = vrcp.f32 %v1488_v11 }
 0x370   : > { %2068 = vlog2.f32 %v1511_v47  ;;  %v1489_v1 = vsel %vm1457_vm3, %v1425_v21, 1.0 }
 0x371   : > { %v2059_v40 = vpop.eup %2058  ;;  %2070 = vrcp.f32 %v1489_v1 }
 0x372   : > { %v1513_v13 = vmul.f32 %v2059_v40, %v1469_v4 }
 0x373   : > { %v2061_v3 = vpop.eup %2060 }
 0x374   : > { %v2063_v45 = vpop.eup %2062  ;;  %2072 = vlog2.f32 %v1513_v13  ;;  %v1515_v23 = vmul.f32 %v2061_v3, %v1470_v12 }
 0x375   : > { %v2065_v24 = vpop.eup %2064  ;;  %v1541_v37 = vmul.f32 0.6931472, %v2063_v45 }
 0x376   : > { %2074 = vlog2.f32 %v1515_v23  ;;  %v1517_v22 = vmul.f32 %v2065_v24, %v1471_v9 }
 0x377   : > { %v1563_v50 = vsub.f32 0.0, %v1541_v37 }
 0x378   : > { %2076 = vlog2.f32 %v1517_v22 }
 0x379   : > { %v2067_v35 = vpop.eup %2066  ;;  %v1579_v46 = vmul.f32 %v1563_v50, %v2811_v5 }
 0x37a   : > { %v2069_v41 = vpop.eup %2068  ;;  %v1519_v39 = vmul.f32 %v2067_v35, %v1472_v10 }
 0x37b   : > { %v2071_v36 = vpop.eup %2070  ;;  %1595 = vst.msk [vmem:[%s2229_s15 + $0x48] sm:$0xff] %vm1101_vm1, %v1579_v46  ;;  %v1543_v42 = vmul.f32 0.6931472, %v2069_v41 }
 0x37c   : > { %2078 = vlog2.f32 %v1519_v39  ;;  %v1521_v43 = vmul.f32 %v2071_v36, %v1473_v28 }
 0x37d   : > { %v1564_v2 = vsub.f32 0.0, %v1543_v42 }
 0x37e   : > { %v2073_v54 = vpop.eup %2072  ;;  %2080 = vlog2.f32 %v1521_v43 }
 0x37f   : > { %v1580_v55 = vmul.f32 %v1564_v2, %v2837_v16  ;;  %v1545_v52 = vmul.f32 0.6931472, %v2073_v54 }
 0x380   : > { %v2075_v5 = vpop.eup %2074 }
 0x381   : > { %1596 = vst.msk [vmem:[%s2229_s15 + $0x50] sm:$0xff] %vm1101_vm1, %v1580_v55  ;;  %v1565_v15 = vsub.f32 0.0, %v1545_v52  ;;  %v1547_v56 = vmul.f32 0.6931472, %v2075_v5 }
 0x382   : > { %v2077_v29 = vpop.eup %2076 }
 0x383   : > { %v1581_v8 = vmul.f32 %v1565_v15, %v2855_v27  ;;  %v1566_v48 = vsub.f32 0.0, %v1547_v56  ;;  %v1549_v30 = vmul.f32 0.6931472, %v2077_v29 }
 0x385   : > { %1597 = vst.msk [vmem:[%s2229_s15 + $0x58] sm:$0xff] %vm1101_vm1, %v1581_v8  ;;  %v1582_v61 = vmul.f32 %v1566_v48, %v2865_v14  ;;  %v1567_v38 = vsub.f32 0.0, %v1549_v30 }
 0x386   : > { %v2079_v16 = vpop.eup %2078 }
 0x387   : > { %1598 = vst.msk [vmem:[%s2229_s15 + $0x60] sm:$0xff] %vm1101_vm1, %v1582_v61  ;;  %v1583_v0 = vmul.f32 %v1567_v38, %v2875_v19  ;;  %v1551_v18 = vmul.f32 0.6931472, %v2079_v16 }
 0x388   : > { %v2081_v44 = vpop.eup %2080 }
 0x389   : > { %1599 = vst.msk [vmem:[%s2229_s15 + $0x68] sm:$0xff] %vm1101_vm1, %v1583_v0  ;;  %v1568_v33 = vsub.f32 0.0, %v1551_v18  ;;  %v1553_v27 = vmul.f32 0.6931472, %v2081_v44 }
 0x38b   : > { %v1584_v32 = vmul.f32 %v1568_v33, %v2890_v26  ;;  %v1569_v57 = vsub.f32 0.0, %v1553_v27 }
 0x38d   : > { %1600 = vst.msk [vmem:[%s2229_s15 + $0x70] sm:$0xff] %vm1101_vm1, %v1584_v32  ;;  %v1585_v60 = vmul.f32 %v1569_v57, %v2904_v20 }
 0x38f   : > { %1601 = vst.msk [vmem:[%s2229_s15 + $0x78] sm:$0xff] %vm1101_vm1, %v1585_v60 }
 0x390 PF: > { %s16_s25 = sadd.s32 1, %s2120_s25   ;;  %s3017_s21 = smov %s2112_s23 }
 0x391   : > { %p13_p10 = scmp.ge.s32.totalorder %s16_s25, 6   ;;  %s3018_s22 = smov %s2116_s24 }
 0x392   : > { %s3019_s23 = smov %s3022_s26  ;;  %s3020_s24 = smov %s3026_s27 }
 0x393   :  { %15 = sbr.rel (!%p13_p10) target bundleno = 3 (0x3), region = 97 }

</bundles_post_ra>
